<compile_context>
chip_gen: v7x
topology: tpu7x:2x2x1
jax: 0.10.0
libtpu: 0.0.40
codegen_flags: <defaults>
</compile_context>

<pallas_src>
import functools

import numpy as np
import jax
import jax.numpy as jnp
from jax.experimental import pallas as pl
from jax.experimental.pallas import tpu as pltpu

NC = 1
NDF = 3
EPS = 1e-5
SLOPE = 0.2          # LeakyReLU negative slope
LANES = 128          # lane-dense final-output width


# --------------------------- fused forward kernel ---------------------------

def _discriminator_kernel(counts,
                          x_ref, w1_ref,
                          w2_ref, g2_ref, gt2_ref, gm2_ref, bt2_ref,
                          w3_ref, g3_ref, gt3_ref, gm3_ref, bt3_ref,
                          w4_ref, g4_ref, gt4_ref, gm4_ref, bt4_ref,
                          w5_ref, o_ref):
    """All 5 layers in one kernel; activations never leave VMEM."""

    def lrelu(z):
        return jnp.where(z > 0, z, SLOPE * z)

    def bn_lrelu(y, g, gt, gamma_cols, beta_cols, count):
        # Train-mode BatchNorm (biased batch stats, PyTorch .train() default)
        # with single-pass sum / sum-of-squares statistics.  g / gt are 0/1
        # group-sum / broadcast matrices mapping the channel-minor column
        # layout (spatial*Cout) <-> per-channel, so the reductions ride on the
        # MXU and only one VPU pass touches the full (M, spatial*Cout) tensor.
        inv_n = 1.0 / count
        s = jnp.sum(y, axis=0, keepdims=True)
        ssq = jnp.sum(y * y, axis=0, keepdims=True)
        mean_c = jnp.dot(s, g, preferred_element_type=jnp.float32) * inv_n
        msq_c = jnp.dot(ssq, g, preferred_element_type=jnp.float32) * inv_n
        # clamp guards E[y^2]-E[y]^2 cancellation so no NaNs leak downstream
        var_c = jnp.maximum(msq_c - mean_c * mean_c, 0.0)
        inv_std_c = jax.lax.rsqrt(var_c + EPS)
        mean_cols = jnp.dot(mean_c, gt, preferred_element_type=jnp.float32)
        inv_cols = jnp.dot(inv_std_c, gt, preferred_element_type=jnp.float32)
        z = gamma_cols * ((y - mean_cols) * inv_cols) + beta_cols
        return lrelu(z)

    # layer 1: Conv(1->3, 4, 2, 1) + LReLU        (bf16 GEMM, f32 accumulate)
    a = lrelu(jnp.dot(x_ref[...], w1_ref[...],
                      preferred_element_type=jnp.float32))
    # layer 2: Conv(3->6) + BN + LReLU
    y = jnp.dot(a.astype(jnp.bfloat16), w2_ref[...],
                preferred_element_type=jnp.float32)
    a = bn_lrelu(y, g2_ref[...], gt2_ref[...], gm2_ref[...], bt2_ref[...],
                 counts[0])
    # layer 3: Conv(6->12) + BN + LReLU
    y = jnp.dot(a.astype(jnp.bfloat16), w3_ref[...],
                preferred_element_type=jnp.float32)
    a = bn_lrelu(y, g3_ref[...], gt3_ref[...], gm3_ref[...], bt3_ref[...],
                 counts[1])
    # layer 4: Conv(12->24) + BN + LReLU
    y = jnp.dot(a.astype(jnp.bfloat16), w4_ref[...],
                preferred_element_type=jnp.float32)
    a = bn_lrelu(y, g4_ref[...], gt4_ref[...], gm4_ref[...], bt4_ref[...],
                 counts[2])
    # layer 5: 1x1 Conv(24->1) + sigmoid (EUP exp + approx reciprocal).
    # w5's columns are zero-padded to 128 so the final store is a full,
    # unmasked lane-dense vst; real columns are sliced off outside.
    logits = jnp.dot(a.astype(jnp.bfloat16), w5_ref[...],
                     preferred_element_type=jnp.float32)
    o_ref[...] = pl.reciprocal(1.0 + jnp.exp(-logits), approx=True)


def _vmem():
    return pl.BlockSpec(memory_space=pltpu.MemorySpace.VMEM)


# --------------------------- init-time conv folding -------------------------

def _conv_dense_matrix(w, h_in, w_in, stride, pad):
    """PyTorch conv weight (Cout,Cin,KH,KW) -> dense (H*W*Cin, OH*OW*Cout)
    operator acting on NHWC-flattened per-sample vectors (channel-minor).
    Zero rows encode the conv's zero padding exactly."""
    cout, cin, kh, kw = w.shape
    oh = (h_in + 2 * pad - kh) // stride + 1
    ow = (w_in + 2 * pad - kw) // stride + 1
    dense = np.zeros((h_in * w_in * cin, oh * ow * cout), np.float32)
    wt = np.transpose(w, (2, 3, 1, 0))  # (KH, KW, Cin, Cout)
    for orow in range(oh):
        for ocol in range(ow):
            out0 = (orow * ow + ocol) * cout
            for r in range(kh):
                irow = orow * stride - pad + r
                if not (0 <= irow < h_in):
                    continue
                for c in range(kw):
                    icol = ocol * stride - pad + c
                    if not (0 <= icol < w_in):
                        continue
                    in0 = (irow * w_in + icol) * cin
                    dense[in0:in0 + cin, out0:out0 + cout] = wt[r, c]
    return dense, oh, ow


def init_params(key, h=28, w=28):
    # (Cin, Cout, K, stride, padding, has_bn) for each Conv2d in `main`
    # (all convs are bias=False, matching the reference module).
    cfgs = [
        (NC, NDF, 4, 2, 1, False),
        (NDF, NDF * 2, 4, 2, 1, True),
        (NDF * 2, NDF * 4, 4, 2, 1, True),
        (NDF * 4, NDF * 8, 4, 2, 1, True),
        (NDF * 8, 1, 1, 1, 0, False),
    ]
    params = []
    cur_h, cur_w = h, w
    for cin, cout, k, s, p, has_bn in cfgs:
        key, wk = jax.random.split(key)
        w_conv = 0.02 * jax.random.normal(wk, (cout, cin, k, k), jnp.float32)
        dense, oh, ow = _conv_dense_matrix(np.asarray(w_conv), cur_h, cur_w, s, p)
        layer = dict(w_dense=jnp.asarray(dense, jnp.bfloat16),
                     cout=cout, oh=oh, ow=ow)
        if has_bn:
            ohw = oh * ow
            gamma = np.ones((cout,), np.float32)    # nn.BatchNorm2d defaults
            beta = np.zeros((cout,), np.float32)
            layer["gamma_cols"] = jnp.asarray(np.tile(gamma, ohw)[None, :])
            layer["beta_cols"] = jnp.asarray(np.tile(beta, ohw)[None, :])
            g = np.tile(np.eye(cout, dtype=np.float32), (ohw, 1))
            layer["g_mat"] = jnp.asarray(g)
            layer["gt_mat"] = jnp.asarray(np.ascontiguousarray(g.T))
        params.append(layer)
        cur_h, cur_w = oh, ow
    # lane-dense final output: pad conv5's output columns up to a multiple of 128
    w5 = params[-1]["w_dense"]
    out_cols = w5.shape[1]
    padded = ((out_cols + LANES - 1) // LANES) * LANES
    params[-1]["w_dense"] = jnp.pad(w5, ((0, 0), (0, padded - out_cols)))
    params[-1]["out_cols"] = out_cols
    params[-1]["padded_cols"] = padded
    return params


# ------------------------------- forward ------------------------------------

def discriminator_cnn_forward(x_nchw, params):
    n = x_nchw.shape[0]
    # single NCHW -> channel-minor-flat layout flip + bf16 cast at the boundary
    x_flat = x_nchw.transpose(0, 2, 3, 1).reshape(n, -1).astype(jnp.bfloat16)

    p1, p2, p3, p4, p5 = params
    counts = tuple(float(n * p["oh"] * p["ow"]) for p in (p2, p3, p4))
    kernel = functools.partial(_discriminator_kernel, counts)

    out = pl.pallas_call(
        kernel,
        out_shape=jax.ShapeDtypeStruct((n, p5["padded_cols"]), jnp.float32),
        in_specs=[_vmem()] * 18,
        out_specs=_vmem(),
    )(x_flat,
      p1["w_dense"],
      p2["w_dense"], p2["g_mat"], p2["gt_mat"], p2["gamma_cols"], p2["beta_cols"],
      p3["w_dense"], p3["g_mat"], p3["gt_mat"], p3["gamma_cols"], p3["beta_cols"],
      p4["w_dense"], p4["g_mat"], p4["gt_mat"], p4["gamma_cols"], p4["beta_cols"],
      p5["w_dense"])

    # conv5 output is (N, OH5*OW5*1); the reference's view(N, -1) + sigmoid
    # (sigmoid already applied in-kernel) collapses to this slice.
    return out[:, :p5["out_cols"]]


if __name__ == "__main__":
    key = jax.random.PRNGKey(0)
    pkey, xkey = jax.random.split(key)
    params = init_params(pkey, h=28, w=28)
    # MNIST-sized GAN input: (N, 1, 28, 28) -> discriminator output (N, 1).
    x = jax.random.normal(xkey, (2, 1, 28, 28), jnp.float32)

    out = jax.jit(lambda img: discriminator_cnn_forward(img, params))(x)
    out = jax.block_until_ready(out)

    assert out.shape == (2, 1), out.shape
    assert bool(jnp.all(jnp.isfinite(out)))
    assert bool(jnp.all((out >= 0.0) & (out <= 1.0)))
    print("KERNEL_OK")
</pallas_src>

<mosaic_0001>
module attributes {stable_mosaic.version = 11 : i64} {
  func.func @_discriminator_kernel(%arg0: memref<2x784xbf16, #tpu.memory_space<vmem>>, %arg1: memref<784x588xbf16, #tpu.memory_space<vmem>>, %arg2: memref<588x294xbf16, #tpu.memory_space<vmem>>, %arg3: memref<294x6xf32, #tpu.memory_space<vmem>>, %arg4: memref<6x294xf32, #tpu.memory_space<vmem>>, %arg5: memref<1x294xf32, #tpu.memory_space<vmem>>, %arg6: memref<1x294xf32, #tpu.memory_space<vmem>>, %arg7: memref<294x108xbf16, #tpu.memory_space<vmem>>, %arg8: memref<108x12xf32, #tpu.memory_space<vmem>>, %arg9: memref<12x108xf32, #tpu.memory_space<vmem>>, %arg10: memref<1x108xf32, #tpu.memory_space<vmem>>, %arg11: memref<1x108xf32, #tpu.memory_space<vmem>>, %arg12: memref<108x24xbf16, #tpu.memory_space<vmem>>, %arg13: memref<24x24xf32, #tpu.memory_space<vmem>>, %arg14: memref<24x24xf32, #tpu.memory_space<vmem>>, %arg15: memref<1x24xf32, #tpu.memory_space<vmem>>, %arg16: memref<1x24xf32, #tpu.memory_space<vmem>>, %arg17: memref<24x128xbf16, #tpu.memory_space<vmem>>, %arg18: memref<2x128xf32, #tpu.memory_space<vmem>>) attributes {dimension_semantics = [], scalar_prefetch = 0 : i64, scratch_operands = 0 : i64, tpu.core_type = #tpu.core_type<tc>} {
    %c0 = arith.constant 0 : index
    %c0_0 = arith.constant 0 : index
    %0 = vector.load %arg0[%c0, %c0_0] : memref<2x784xbf16, #tpu.memory_space<vmem>>, vector<2x784xbf16>
    %c0_1 = arith.constant 0 : index
    %c0_2 = arith.constant 0 : index
    %1 = vector.load %arg1[%c0_1, %c0_2] : memref<784x588xbf16, #tpu.memory_space<vmem>>, vector<784x588xbf16>
    %cst = arith.constant dense<0.000000e+00> : vector<2x588xf32>
    %2 = tpu.matmul %0, %1, %cst {dimension_numbers = #tpu.dot_dimension_numbers<[1], [0], [0], [1], [0, 0, 1, 1], [], []>} : vector<2x784xbf16>, vector<784x588xbf16>, vector<2x588xf32> -> vector<2x588xf32>
    %cst_3 = arith.constant 0.000000e+00 : f32
    %3 = vector.broadcast %cst_3 : f32 to vector<2x588xf32>
    %4 = arith.cmpf ogt, %2, %3 : vector<2x588xf32>
    %cst_4 = arith.constant 2.000000e-01 : f32
    %5 = vector.broadcast %cst_4 : f32 to vector<2x588xf32>
    %6 = arith.mulf %5, %2 : vector<2x588xf32>
    %7 = arith.select %4, %2, %6 : vector<2x588xi1>, vector<2x588xf32>
    %8 = arith.truncf %7 : vector<2x588xf32> to vector<2x588xbf16>
    %c0_5 = arith.constant 0 : index
    %c0_6 = arith.constant 0 : index
    %9 = vector.load %arg2[%c0_5, %c0_6] : memref<588x294xbf16, #tpu.memory_space<vmem>>, vector<588x294xbf16>
    %cst_7 = arith.constant dense<0.000000e+00> : vector<2x294xf32>
    %10 = tpu.matmul %8, %9, %cst_7 {dimension_numbers = #tpu.dot_dimension_numbers<[1], [0], [0], [1], [0, 0, 1, 1], [], []>} : vector<2x588xbf16>, vector<588x294xbf16>, vector<2x294xf32> -> vector<2x294xf32>
    %c0_8 = arith.constant 0 : index
    %c0_9 = arith.constant 0 : index
    %11 = vector.load %arg3[%c0_8, %c0_9] : memref<294x6xf32, #tpu.memory_space<vmem>>, vector<294x6xf32>
    %c0_10 = arith.constant 0 : index
    %c0_11 = arith.constant 0 : index
    %12 = vector.load %arg4[%c0_10, %c0_11] : memref<6x294xf32, #tpu.memory_space<vmem>>, vector<6x294xf32>
    %c0_12 = arith.constant 0 : index
    %c0_13 = arith.constant 0 : index
    %13 = vector.load %arg5[%c0_12, %c0_13] : memref<1x294xf32, #tpu.memory_space<vmem>>, vector<1x294xf32>
    %c0_14 = arith.constant 0 : index
    %c0_15 = arith.constant 0 : index
    %14 = vector.load %arg6[%c0_14, %c0_15] : memref<1x294xf32, #tpu.memory_space<vmem>>, vector<1x294xf32>
    %cst_16 = arith.constant dense<0.000000e+00> : vector<294xf32>
    %15 = vector.multi_reduction <add>, %10, %cst_16 [0] : vector<2x294xf32> to vector<294xf32>
    %16 = vector.shape_cast %15 : vector<294xf32> to vector<1x294xf32>
    %17 = arith.mulf %10, %10 : vector<2x294xf32>
    %cst_17 = arith.constant dense<0.000000e+00> : vector<294xf32>
    %18 = vector.multi_reduction <add>, %17, %cst_17 [0] : vector<2x294xf32> to vector<294xf32>
    %19 = vector.shape_cast %18 : vector<294xf32> to vector<1x294xf32>
    %cst_18 = arith.constant dense<0.000000e+00> : vector<1x6xf32>
    %20 = tpu.matmul %16, %11, %cst_18 {dimension_numbers = #tpu.dot_dimension_numbers<[1], [0], [0], [1], [0, 0, 1, 1], [], []>} : vector<1x294xf32>, vector<294x6xf32>, vector<1x6xf32> -> vector<1x6xf32>
    %cst_19 = arith.constant 0.0102040814 : f32
    %21 = vector.broadcast %cst_19 : f32 to vector<1x6xf32>
    %22 = arith.mulf %20, %21 : vector<1x6xf32>
    %cst_20 = arith.constant dense<0.000000e+00> : vector<1x6xf32>
    %23 = tpu.matmul %19, %11, %cst_20 {dimension_numbers = #tpu.dot_dimension_numbers<[1], [0], [0], [1], [0, 0, 1, 1], [], []>} : vector<1x294xf32>, vector<294x6xf32>, vector<1x6xf32> -> vector<1x6xf32>
    %cst_21 = arith.constant 0.0102040814 : f32
    %24 = vector.broadcast %cst_21 : f32 to vector<1x6xf32>
    %25 = arith.mulf %23, %24 : vector<1x6xf32>
    %26 = arith.mulf %22, %22 : vector<1x6xf32>
    %27 = arith.subf %25, %26 : vector<1x6xf32>
    %cst_22 = arith.constant 0.000000e+00 : f32
    %28 = vector.broadcast %cst_22 : f32 to vector<1x6xf32>
    %29 = arith.maximumf %27, %28 : vector<1x6xf32>
    %cst_23 = arith.constant 9.99999974E-6 : f32
    %30 = vector.broadcast %cst_23 : f32 to vector<1x6xf32>
    %31 = arith.addf %29, %30 : vector<1x6xf32>
    %32 = math.rsqrt %31 : vector<1x6xf32>
    %cst_24 = arith.constant dense<0.000000e+00> : vector<1x294xf32>
    %33 = tpu.matmul %22, %12, %cst_24 {dimension_numbers = #tpu.dot_dimension_numbers<[1], [0], [0], [1], [0, 0, 1, 1], [], []>} : vector<1x6xf32>, vector<6x294xf32>, vector<1x294xf32> -> vector<1x294xf32>
    %cst_25 = arith.constant dense<0.000000e+00> : vector<1x294xf32>
    %34 = tpu.matmul %32, %12, %cst_25 {dimension_numbers = #tpu.dot_dimension_numbers<[1], [0], [0], [1], [0, 0, 1, 1], [], []>} : vector<1x6xf32>, vector<6x294xf32>, vector<1x294xf32> -> vector<1x294xf32>
    %35 = vector.broadcast %33 : vector<1x294xf32> to vector<2x294xf32>
    %36 = arith.subf %10, %35 : vector<2x294xf32>
    %37 = vector.broadcast %34 : vector<1x294xf32> to vector<2x294xf32>
    %38 = arith.mulf %36, %37 : vector<2x294xf32>
    %39 = vector.broadcast %13 : vector<1x294xf32> to vector<2x294xf32>
    %40 = arith.mulf %39, %38 : vector<2x294xf32>
    %41 = vector.broadcast %14 : vector<1x294xf32> to vector<2x294xf32>
    %42 = arith.addf %40, %41 : vector<2x294xf32>
    %cst_26 = arith.constant 0.000000e+00 : f32
    %43 = vector.broadcast %cst_26 : f32 to vector<2x294xf32>
    %44 = arith.cmpf ogt, %42, %43 : vector<2x294xf32>
    %cst_27 = arith.constant 2.000000e-01 : f32
    %45 = vector.broadcast %cst_27 : f32 to vector<2x294xf32>
    %46 = arith.mulf %45, %42 : vector<2x294xf32>
    %47 = arith.select %44, %42, %46 : vector<2x294xi1>, vector<2x294xf32>
    %48 = arith.truncf %47 : vector<2x294xf32> to vector<2x294xbf16>
    %c0_28 = arith.constant 0 : index
    %c0_29 = arith.constant 0 : index
    %49 = vector.load %arg7[%c0_28, %c0_29] : memref<294x108xbf16, #tpu.memory_space<vmem>>, vector<294x108xbf16>
    %cst_30 = arith.constant dense<0.000000e+00> : vector<2x108xf32>
    %50 = tpu.matmul %48, %49, %cst_30 {dimension_numbers = #tpu.dot_dimension_numbers<[1], [0], [0], [1], [0, 0, 1, 1], [], []>} : vector<2x294xbf16>, vector<294x108xbf16>, vector<2x108xf32> -> vector<2x108xf32>
    %c0_31 = arith.constant 0 : index
    %c0_32 = arith.constant 0 : index
    %51 = vector.load %arg8[%c0_31, %c0_32] : memref<108x12xf32, #tpu.memory_space<vmem>>, vector<108x12xf32>
    %c0_33 = arith.constant 0 : index
    %c0_34 = arith.constant 0 : index
    %52 = vector.load %arg9[%c0_33, %c0_34] : memref<12x108xf32, #tpu.memory_space<vmem>>, vector<12x108xf32>
    %c0_35 = arith.constant 0 : index
    %c0_36 = arith.constant 0 : index
    %53 = vector.load %arg10[%c0_35, %c0_36] : memref<1x108xf32, #tpu.memory_space<vmem>>, vector<1x108xf32>
    %c0_37 = arith.constant 0 : index
    %c0_38 = arith.constant 0 : index
    %54 = vector.load %arg11[%c0_37, %c0_38] : memref<1x108xf32, #tpu.memory_space<vmem>>, vector<1x108xf32>
    %cst_39 = arith.constant dense<0.000000e+00> : vector<108xf32>
    %55 = vector.multi_reduction <add>, %50, %cst_39 [0] : vector<2x108xf32> to vector<108xf32>
    %56 = vector.shape_cast %55 : vector<108xf32> to vector<1x108xf32>
    %57 = arith.mulf %50, %50 : vector<2x108xf32>
    %cst_40 = arith.constant dense<0.000000e+00> : vector<108xf32>
    %58 = vector.multi_reduction <add>, %57, %cst_40 [0] : vector<2x108xf32> to vector<108xf32>
    %59 = vector.shape_cast %58 : vector<108xf32> to vector<1x108xf32>
    %cst_41 = arith.constant dense<0.000000e+00> : vector<1x12xf32>
    %60 = tpu.matmul %56, %51, %cst_41 {dimension_numbers = #tpu.dot_dimension_numbers<[1], [0], [0], [1], [0, 0, 1, 1], [], []>} : vector<1x108xf32>, vector<108x12xf32>, vector<1x12xf32> -> vector<1x12xf32>
    %cst_42 = arith.constant 0.055555556 : f32
    %61 = vector.broadcast %cst_42 : f32 to vector<1x12xf32>
    %62 = arith.mulf %60, %61 : vector<1x12xf32>
    %cst_43 = arith.constant dense<0.000000e+00> : vector<1x12xf32>
    %63 = tpu.matmul %59, %51, %cst_43 {dimension_numbers = #tpu.dot_dimension_numbers<[1], [0], [0], [1], [0, 0, 1, 1], [], []>} : vector<1x108xf32>, vector<108x12xf32>, vector<1x12xf32> -> vector<1x12xf32>
    %cst_44 = arith.constant 0.055555556 : f32
    %64 = vector.broadcast %cst_44 : f32 to vector<1x12xf32>
    %65 = arith.mulf %63, %64 : vector<1x12xf32>
    %66 = arith.mulf %62, %62 : vector<1x12xf32>
    %67 = arith.subf %65, %66 : vector<1x12xf32>
    %cst_45 = arith.constant 0.000000e+00 : f32
    %68 = vector.broadcast %cst_45 : f32 to vector<1x12xf32>
    %69 = arith.maximumf %67, %68 : vector<1x12xf32>
    %cst_46 = arith.constant 9.99999974E-6 : f32
    %70 = vector.broadcast %cst_46 : f32 to vector<1x12xf32>
    %71 = arith.addf %69, %70 : vector<1x12xf32>
    %72 = math.rsqrt %71 : vector<1x12xf32>
    %cst_47 = arith.constant dense<0.000000e+00> : vector<1x108xf32>
    %73 = tpu.matmul %62, %52, %cst_47 {dimension_numbers = #tpu.dot_dimension_numbers<[1], [0], [0], [1], [0, 0, 1, 1], [], []>} : vector<1x12xf32>, vector<12x108xf32>, vector<1x108xf32> -> vector<1x108xf32>
    %cst_48 = arith.constant dense<0.000000e+00> : vector<1x108xf32>
    %74 = tpu.matmul %72, %52, %cst_48 {dimension_numbers = #tpu.dot_dimension_numbers<[1], [0], [0], [1], [0, 0, 1, 1], [], []>} : vector<1x12xf32>, vector<12x108xf32>, vector<1x108xf32> -> vector<1x108xf32>
    %75 = vector.broadcast %73 : vector<1x108xf32> to vector<2x108xf32>
    %76 = arith.subf %50, %75 : vector<2x108xf32>
    %77 = vector.broadcast %74 : vector<1x108xf32> to vector<2x108xf32>
    %78 = arith.mulf %76, %77 : vector<2x108xf32>
    %79 = vector.broadcast %53 : vector<1x108xf32> to vector<2x108xf32>
    %80 = arith.mulf %79, %78 : vector<2x108xf32>
    %81 = vector.broadcast %54 : vector<1x108xf32> to vector<2x108xf32>
    %82 = arith.addf %80, %81 : vector<2x108xf32>
    %cst_49 = arith.constant 0.000000e+00 : f32
    %83 = vector.broadcast %cst_49 : f32 to vector<2x108xf32>
    %84 = arith.cmpf ogt, %82, %83 : vector<2x108xf32>
    %cst_50 = arith.constant 2.000000e-01 : f32
    %85 = vector.broadcast %cst_50 : f32 to vector<2x108xf32>
    %86 = arith.mulf %85, %82 : vector<2x108xf32>
    %87 = arith.select %84, %82, %86 : vector<2x108xi1>, vector<2x108xf32>
    %88 = arith.truncf %87 : vector<2x108xf32> to vector<2x108xbf16>
    %c0_51 = arith.constant 0 : index
    %c0_52 = arith.constant 0 : index
    %89 = vector.load %arg12[%c0_51, %c0_52] : memref<108x24xbf16, #tpu.memory_space<vmem>>, vector<108x24xbf16>
    %cst_53 = arith.constant dense<0.000000e+00> : vector<2x24xf32>
    %90 = tpu.matmul %88, %89, %cst_53 {dimension_numbers = #tpu.dot_dimension_numbers<[1], [0], [0], [1], [0, 0, 1, 1], [], []>} : vector<2x108xbf16>, vector<108x24xbf16>, vector<2x24xf32> -> vector<2x24xf32>
    %c0_54 = arith.constant 0 : index
    %c0_55 = arith.constant 0 : index
    %91 = vector.load %arg13[%c0_54, %c0_55] : memref<24x24xf32, #tpu.memory_space<vmem>>, vector<24x24xf32>
    %c0_56 = arith.constant 0 : index
    %c0_57 = arith.constant 0 : index
    %92 = vector.load %arg14[%c0_56, %c0_57] : memref<24x24xf32, #tpu.memory_space<vmem>>, vector<24x24xf32>
    %c0_58 = arith.constant 0 : index
    %c0_59 = arith.constant 0 : index
    %93 = vector.load %arg15[%c0_58, %c0_59] : memref<1x24xf32, #tpu.memory_space<vmem>>, vector<1x24xf32>
    %c0_60 = arith.constant 0 : index
    %c0_61 = arith.constant 0 : index
    %94 = vector.load %arg16[%c0_60, %c0_61] : memref<1x24xf32, #tpu.memory_space<vmem>>, vector<1x24xf32>
    %cst_62 = arith.constant dense<0.000000e+00> : vector<24xf32>
    %95 = vector.multi_reduction <add>, %90, %cst_62 [0] : vector<2x24xf32> to vector<24xf32>
    %96 = vector.shape_cast %95 : vector<24xf32> to vector<1x24xf32>
    %97 = arith.mulf %90, %90 : vector<2x24xf32>
    %cst_63 = arith.constant dense<0.000000e+00> : vector<24xf32>
    %98 = vector.multi_reduction <add>, %97, %cst_63 [0] : vector<2x24xf32> to vector<24xf32>
    %99 = vector.shape_cast %98 : vector<24xf32> to vector<1x24xf32>
    %cst_64 = arith.constant dense<0.000000e+00> : vector<1x24xf32>
    %100 = tpu.matmul %96, %91, %cst_64 {dimension_numbers = #tpu.dot_dimension_numbers<[1], [0], [0], [1], [0, 0, 1, 1], [], []>} : vector<1x24xf32>, vector<24x24xf32>, vector<1x24xf32> -> vector<1x24xf32>
    %cst_65 = arith.constant 5.000000e-01 : f32
    %101 = vector.broadcast %cst_65 : f32 to vector<1x24xf32>
    %102 = arith.mulf %100, %101 : vector<1x24xf32>
    %cst_66 = arith.constant dense<0.000000e+00> : vector<1x24xf32>
    %103 = tpu.matmul %99, %91, %cst_66 {dimension_numbers = #tpu.dot_dimension_numbers<[1], [0], [0], [1], [0, 0, 1, 1], [], []>} : vector<1x24xf32>, vector<24x24xf32>, vector<1x24xf32> -> vector<1x24xf32>
    %cst_67 = arith.constant 5.000000e-01 : f32
    %104 = vector.broadcast %cst_67 : f32 to vector<1x24xf32>
    %105 = arith.mulf %103, %104 : vector<1x24xf32>
    %106 = arith.mulf %102, %102 : vector<1x24xf32>
    %107 = arith.subf %105, %106 : vector<1x24xf32>
    %cst_68 = arith.constant 0.000000e+00 : f32
    %108 = vector.broadcast %cst_68 : f32 to vector<1x24xf32>
    %109 = arith.maximumf %107, %108 : vector<1x24xf32>
    %cst_69 = arith.constant 9.99999974E-6 : f32
    %110 = vector.broadcast %cst_69 : f32 to vector<1x24xf32>
    %111 = arith.addf %109, %110 : vector<1x24xf32>
    %112 = math.rsqrt %111 : vector<1x24xf32>
    %cst_70 = arith.constant dense<0.000000e+00> : vector<1x24xf32>
    %113 = tpu.matmul %102, %92, %cst_70 {dimension_numbers = #tpu.dot_dimension_numbers<[1], [0], [0], [1], [0, 0, 1, 1], [], []>} : vector<1x24xf32>, vector<24x24xf32>, vector<1x24xf32> -> vector<1x24xf32>
    %cst_71 = arith.constant dense<0.000000e+00> : vector<1x24xf32>
    %114 = tpu.matmul %112, %92, %cst_71 {dimension_numbers = #tpu.dot_dimension_numbers<[1], [0], [0], [1], [0, 0, 1, 1], [], []>} : vector<1x24xf32>, vector<24x24xf32>, vector<1x24xf32> -> vector<1x24xf32>
    %115 = vector.broadcast %113 : vector<1x24xf32> to vector<2x24xf32>
    %116 = arith.subf %90, %115 : vector<2x24xf32>
    %117 = vector.broadcast %114 : vector<1x24xf32> to vector<2x24xf32>
    %118 = arith.mulf %116, %117 : vector<2x24xf32>
    %119 = vector.broadcast %93 : vector<1x24xf32> to vector<2x24xf32>
    %120 = arith.mulf %119, %118 : vector<2x24xf32>
    %121 = vector.broadcast %94 : vector<1x24xf32> to vector<2x24xf32>
    %122 = arith.addf %120, %121 : vector<2x24xf32>
    %cst_72 = arith.constant 0.000000e+00 : f32
    %123 = vector.broadcast %cst_72 : f32 to vector<2x24xf32>
    %124 = arith.cmpf ogt, %122, %123 : vector<2x24xf32>
    %cst_73 = arith.constant 2.000000e-01 : f32
    %125 = vector.broadcast %cst_73 : f32 to vector<2x24xf32>
    %126 = arith.mulf %125, %122 : vector<2x24xf32>
    %127 = arith.select %124, %122, %126 : vector<2x24xi1>, vector<2x24xf32>
    %128 = arith.truncf %127 : vector<2x24xf32> to vector<2x24xbf16>
    %c0_74 = arith.constant 0 : index
    %c0_75 = arith.constant 0 : index
    %129 = vector.load %arg17[%c0_74, %c0_75] : memref<24x128xbf16, #tpu.memory_space<vmem>>, vector<24x128xbf16>
    %cst_76 = arith.constant dense<0.000000e+00> : vector<2x128xf32>
    %130 = tpu.matmul %128, %129, %cst_76 {dimension_numbers = #tpu.dot_dimension_numbers<[1], [0], [0], [1], [0, 0, 1, 1], [], []>} : vector<2x24xbf16>, vector<24x128xbf16>, vector<2x128xf32> -> vector<2x128xf32>
    %cst_77 = arith.constant 0.000000e+00 : f32
    %131 = vector.broadcast %cst_77 : f32 to vector<2x128xf32>
    %132 = arith.subf %131, %130 : vector<2x128xf32>
    %133 = math.exp %132 : vector<2x128xf32>
    %cst_78 = arith.constant 1.000000e+00 : f32
    %134 = vector.broadcast %cst_78 : f32 to vector<2x128xf32>
    %135 = arith.addf %134, %133 : vector<2x128xf32>
    %136 = tpu.reciprocal %135 {approx = true} : vector<2x128xf32> -> vector<2x128xf32>
    %c0_79 = arith.constant 0 : index
    %c0_80 = arith.constant 0 : index
    %137 = vector.load %arg18[%c0_79, %c0_80] : memref<2x128xf32, #tpu.memory_space<vmem>>, vector<2x128xf32>
    tpu.vector_store %arg18[%c0_79, %c0_80], %136 {strides = array<i32>} : memref<2x128xf32, #tpu.memory_space<vmem>>, vector<2x128xf32>,
    return
  }
}

</mosaic_0001>

<bundles_post_ra>
// kernel: _lambda_.1
= control target key start
LH: loop header
LB: loop body
LE: loop exit
PB: predicated region body
PF: predicated region fallthrough
CT: control target
= control target key end

     0   :  { %v6708_v36 = vmov 1966171168   ;;  %v360_v38 = vlaneseq  ;;  %vm1684_vm0 = vcmask 130048   ;;  %vm6711_vm1 = vmmov 0   ;;  %s8417_s1 = inlined_call_operand.vmem [shape: bf16[784,588], index: 1, kind: input, shape index: {}]   ;;  %s8418_s0 = inlined_call_operand.vmem [shape: bf16[2,784], index: 0, kind: input, shape index: {}]   ;;  %s8419_s2 = inlined_call_operand.vmem [shape: bf16[588,294], index: 2, kind: input, shape index: {}]   ;;  %s8420_s3 = inlined_call_operand.vmem [shape: f32[294,6], index: 3, kind: input, shape index: {}]   ;;  %s8421_s4 = inlined_call_operand.vmem [shape: f32[6,294], index: 4, kind: input, shape index: {}]   ;;  %s8422_s7 = inlined_call_operand.vmem [shape: bf16[294,108], index: 7, kind: input, shape index: {}]   ;;  %s8423_s5 = inlined_call_operand.vmem [shape: f32[1,294], index: 5, kind: input, shape index: {}]   ;;  %s8424_s6 = inlined_call_operand.vmem [shape: f32[1,294], index: 6, kind: input, shape index: {}]   ;;  %s8425_s8 = inlined_call_operand.vmem [shape: f32[108,12], index: 8, kind: input, shape index: {}]   ;;  %s8426_s9 = inlined_call_operand.vmem [shape: f32[12,108], index: 9, kind: input, shape index: {}]   ;;  %s8427_s12 = inlined_call_operand.vmem [shape: bf16[108,24], index: 12, kind: input, shape index: {}]   ;;  %s8428_s10 = inlined_call_operand.vmem [shape: f32[1,108], index: 10, kind: input, shape index: {}]   ;;  %s8429_s11 = inlined_call_operand.vmem [shape: f32[1,108], index: 11, kind: input, shape index: {}]   ;;  %s8430_s13 = inlined_call_operand.vmem [shape: f32[24,24], index: 13, kind: input, shape index: {}, may-alias: {13,14}]   ;;  %s8431_s14 = inlined_call_operand.vmem [shape: f32[24,24], index: 14, kind: input, shape index: {}, may-alias: {13,14}]   ;;  %s8432_s17 = inlined_call_operand.vmem [shape: bf16[24,128], index: 17, kind: input, shape index: {}]   ;;  %s8433_s15 = inlined_call_operand.vmem [shape: f32[1,24], index: 15, kind: input, shape index: {}]   ;;  %s8434_s16 = inlined_call_operand.vmem [shape: f32[1,24], index: 16, kind: input, shape index: {}]   ;;  %s8435_s18 = inlined_call_operand.vmem [shape: f32[2,128], index: 18, kind: output, shape index: {}]  }
   0x1   :  { %8438 = sst [smem:[#allocation2_spill]] %s8417_s1  ;;  %v358_v37 = vunpack.c.l.s4 %v6708_v36  ;;  %vm2937_vm6 = vcmask 1045504   ;;  %vm2933_vm8 = vcmask 621568   ;;  %vm3247_vm9 = vcmask 304128  }
   0x2   :  { %8439 = sst [smem:[#allocation3_spill]] %s8418_s0  ;;  %s8441_s29 = sld [smem:[#allocation2_spill]]  ;;  %v6926_v43 = vshrl.u32 %v360_v38, 7  ;;  %vm3232_vm10 = vcmask 1041408   ;;  %vm3279_vm11 = vcmask 310272   ;;  %vm3576_vm12 = vcmask 48128  }
   0x3   :  { %8440 = sst [smem:[#allocation4_spill]] %s8419_s2  ;;  %v359_v42 = vunpack.c.0.s8 %v358_v37  ;;  %s8442_s23 = sld [smem:[#allocation3_spill]]  ;;  %vm4105_vm13 = vcmask 1042432  }
   0x4   :  { %s8443_s21 = sld [smem:[#allocation4_spill]] }
   0x5   :  { %v362_v49 = vsub.s32 %v359_v42, %v6926_v43 }
   0x8   :  { %v6178_v0 = vld [vmem:[%s8441_s29 + $0x4] ss:$20 sps:$4 sm:$0xff]   ;;  %v6180_v1 = vld [vmem:[%s8441_s29 + $0xc] ss:$20 sps:$4 sm:$0xff]   ;;  %v6183_v3 = vld [vmem:[%s8441_s29 + $0x8] ss:$20 sps:$4 sm:$0xff]  }
   0x9   :  { %1688 = vmatprep.subr.bf16.mxu0 %v6178_v0  ;;  %v6182_v2 = vld [vmem:[%s8441_s29] ss:$20 sps:$4 sm:$0xff]   ;;  %1852 = vmatprep.subr.bf16.mxu1 %v6180_v1  ;;  %v6188_v6 = vld [vmem:[%s8441_s29 + $0x28] ss:$20 sps:$4 sm:$0xff]   ;;  %v6189_v7 = vld [vmem:[%s8441_s29 + $0x30] ss:$20 sps:$4 sm:$0xff]  }
   0xa   :  { %v6184_v4 = vld [vmem:[%s8441_s29 + $0x2c] ss:$20 sps:$4 sm:$0xff]   ;;  %1689 = vmatpush1.bf16.msra.mxu0 %v6182_v2  ;;  %1853 = vmatpush1.bf16.msra.mxu1 %v6183_v3  ;;  %v6186_v5 = vld [vmem:[%s8441_s29 + $0x34] ss:$20 sps:$4 sm:$0xff]   ;;  %v6192_v9 = vld [vmem:[%s8441_s29 + $0x5c] ss:$20 sps:$4 sm:$0xff]  }
   0xb   :  { %1690 = vmatprep.subr.bf16.mxu0 %v6184_v4  ;;  %1854 = vmatprep.subr.bf16.mxu1 %v6186_v5  ;;  %v6190_v8 = vld [vmem:[%s8441_s29 + $0x54] ss:$20 sps:$4 sm:$0xff]   ;;  %v6194_v10 = vld [vmem:[%s8441_s29 + $0x50] ss:$20 sps:$4 sm:$0xff]   ;;  %v6195_v11 = vld [vmem:[%s8441_s29 + $0x58] ss:$20 sps:$4 sm:$0xff]  }
   0xc   :  { %v6196_v12 = vld [vmem:[%s8441_s29 + $0x7c] ss:$20 sps:$4 sm:$0xff]   ;;  %v6198_v13 = vld [vmem:[%s8441_s29 + $0x84] ss:$20 sps:$4 sm:$0xff]   ;;  %v6201_v15 = vld [vmem:[%s8441_s29 + $0x80] ss:$20 sps:$4 sm:$0xff]  }
   0xd   :  { %v6200_v14 = vld [vmem:[%s8441_s29 + $0x78] ss:$20 sps:$4 sm:$0xff]   ;;  %v6206_v18 = vld [vmem:[%s8441_s29 + $0xa0] ss:$20 sps:$4 sm:$0xff]   ;;  %v6207_v19 = vld [vmem:[%s8441_s29 + $0xa8] ss:$20 sps:$4 sm:$0xff]  }
   0xe   :  { %1691 = vmatpush1.bf16.msra.mxu0 %v6188_v6  ;;  %1855 = vmatpush1.bf16.msra.mxu1 %v6189_v7  ;;  %v6202_v16 = vld [vmem:[%s8441_s29 + $0xa4] ss:$20 sps:$4 sm:$0xff]   ;;  %v6204_v17 = vld [vmem:[%s8441_s29 + $0xac] ss:$20 sps:$4 sm:$0xff]   ;;  %v6210_v21 = vld [vmem:[%s8441_s29 + $0xd4] ss:$20 sps:$4 sm:$0xff]  }
   0xf   :  { %1692 = vmatprep.subr.bf16.mxu0 %v6190_v8  ;;  %1856 = vmatprep.subr.bf16.mxu1 %v6192_v9  ;;  %v6208_v20 = vld [vmem:[%s8441_s29 + $0xcc] ss:$20 sps:$4 sm:$0xff]   ;;  %v6212_v22 = vld [vmem:[%s8441_s29 + $0xc8] ss:$20 sps:$4 sm:$0xff]   ;;  %v6213_v23 = vld [vmem:[%s8441_s29 + $0xd0] ss:$20 sps:$4 sm:$0xff]  }
  0x10   :  { %v6214_v24 = vld [vmem:[%s8441_s29 + $0xf4] ss:$20 sps:$4 sm:$0xff]   ;;  %v6216_v25 = vld [vmem:[%s8441_s29 + $0xfc] ss:$20 sps:$4 sm:$0xff]   ;;  %v6219_v27 = vld [vmem:[%s8441_s29 + $0xf8] ss:$20 sps:$4 sm:$0xff]  }
  0x11   :  { %v6218_v26 = vld [vmem:[%s8441_s29 + $0xf0] ss:$20 sps:$4 sm:$0xff]   ;;  %v6224_v30 = vld [vmem:[%s8441_s29 + $0x118] ss:$20 sps:$4 sm:$0xff]   ;;  %v6225_v31 = vld [vmem:[%s8441_s29 + $0x120] ss:$20 sps:$4 sm:$0xff]  }
  0x12   :  { %1693 = vmatpush1.bf16.msra.mxu0 %v6194_v10  ;;  %1857 = vmatpush1.bf16.msra.mxu1 %v6195_v11  ;;  %v6220_v28 = vld [vmem:[%s8441_s29 + $0x11c] ss:$20 sps:$4 sm:$0xff]   ;;  %v6222_v29 = vld [vmem:[%s8441_s29 + $0x124] ss:$20 sps:$4 sm:$0xff]   ;;  %v6228_v33 = vld [vmem:[%s8441_s29 + $0x14c] ss:$20 sps:$4 sm:$0xff]  }
  0x13   :  { %1694 = vmatprep.subr.bf16.mxu0 %v6196_v12  ;;  %1858 = vmatprep.subr.bf16.mxu1 %v6198_v13  ;;  %v6226_v32 = vld [vmem:[%s8441_s29 + $0x144] ss:$20 sps:$4 sm:$0xff]   ;;  %v6230_v34 = vld [vmem:[%s8441_s29 + $0x140] ss:$20 sps:$4 sm:$0xff]   ;;  %v6231_v35 = vld [vmem:[%s8441_s29 + $0x148] ss:$20 sps:$4 sm:$0xff]  }
  0x14   :  { %v6232_v39 = vld [vmem:[%s8441_s29 + $0x16c] ss:$20 sps:$4 sm:$0xff]   ;;  %v6234_v40 = vld [vmem:[%s8441_s29 + $0x174] ss:$20 sps:$4 sm:$0xff]   ;;  %v6237_v44 = vld [vmem:[%s8441_s29 + $0x170] ss:$20 sps:$4 sm:$0xff]  }
  0x15   :  { %v6236_v41 = vld [vmem:[%s8441_s29 + $0x168] ss:$20 sps:$4 sm:$0xff]   ;;  %v6242_v47 = vld [vmem:[%s8441_s29 + $0x190] ss:$20 sps:$4 sm:$0xff]   ;;  %v6243_v48 = vld [vmem:[%s8441_s29 + $0x198] ss:$20 sps:$4 sm:$0xff]  }
  0x16   :  { %1695 = vmatpush1.bf16.msra.mxu0 %v6200_v14  ;;  %1859 = vmatpush1.bf16.msra.mxu1 %v6201_v15  ;;  %v6238_v45 = vld [vmem:[%s8441_s29 + $0x194] ss:$20 sps:$4 sm:$0xff]   ;;  %v6240_v46 = vld [vmem:[%s8441_s29 + $0x19c] ss:$20 sps:$4 sm:$0xff]   ;;  %v6246_v51 = vld [vmem:[%s8441_s29 + $0x1c4] ss:$20 sps:$4 sm:$0xff]  }
  0x17   :  { %1696 = vmatprep.subr.bf16.mxu0 %v6202_v16  ;;  %1860 = vmatprep.subr.bf16.mxu1 %v6204_v17  ;;  %v6244_v50 = vld [vmem:[%s8441_s29 + $0x1bc] ss:$20 sps:$4 sm:$0xff]   ;;  %v60_v52 = vld [vmem:[%s8442_s23] sm:$0x7f]  ;;  %v6248_v53 = vld [vmem:[%s8441_s29 + $0x1b8] ss:$20 sps:$4 sm:$0xff]  }
  0x18   :  { %v363_v54 = vrot.slane %v60_v52, %v362_v49  ;;  %v6249_v55 = vld [vmem:[%s8441_s29 + $0x1c0] ss:$20 sps:$4 sm:$0xff]   ;;  %v6250_v56 = vld [vmem:[%s8441_s29 + $0x1e4] ss:$20 sps:$4 sm:$0xff]   ;;  %v6255_v61 = vld [vmem:[%s8441_s29 + $0x1e8] ss:$20 sps:$4 sm:$0xff]   ;;  %v356_v8 = vcombine.high %v60_v52, %v60_v52 }
  0x19   :  { %v6252_v57 = vld [vmem:[%s8441_s29 + $0x1ec] ss:$20 sps:$4 sm:$0xff]   ;;  %v6258_v63 = vld [vmem:[%s8441_s29 + $0x214] ss:$20 sps:$4 sm:$0xff]   ;;  %v6261_v1 = vld [vmem:[%s8441_s29 + $0x210] ss:$20 sps:$4 sm:$0xff]  }
  0x1a   :  { %1697 = vmatpush1.bf16.msra.mxu0 %v6206_v18  ;;  %1861 = vmatpush1.bf16.msra.mxu1 %v6207_v19  ;;  %v371_v58 = vcombine.high %v363_v54, %v363_v54  ;;  %v6254_v59 = vld [vmem:[%s8441_s29 + $0x1e0] ss:$20 sps:$4 sm:$0xff]   ;;  %v6260_v0 = vld [vmem:[%s8441_s29 + $0x208] ss:$20 sps:$4 sm:$0xff]   ;;  %v6266_v4 = vld [vmem:[%s8441_s29 + $0x230] ss:$20 sps:$4 sm:$0xff]   ;;  %v370_v11 = vrot.slane %v356_v8, %v362_v49  ;;  %v7020_v16 = vrot.slane %v363_v54, %v362_v49 }
  0x1b   :  { %1698 = vmatprep.subr.bf16.mxu0 %v6208_v20  ;;  %1862 = vmatprep.subr.bf16.mxu1 %v6210_v21  ;;  %v6256_v62 = vld [vmem:[%s8441_s29 + $0x20c] ss:$20 sps:$4 sm:$0xff]   ;;  %v6262_v2 = vld [vmem:[%s8441_s29 + $0x234] ss:$20 sps:$4 sm:$0xff]   ;;  %v6264_v3 = vld [vmem:[%s8441_s29 + $0x23c] ss:$20 sps:$4 sm:$0xff]  }
  0x1c   :  { %v6968_v60 = vrot.slane %v371_v58, %v362_v49  ;;  %v6267_v5 = vld [vmem:[%s8441_s29 + $0x238] ss:$20 sps:$4 sm:$0xff]   ;;  %v6268_v6 = vld [vmem:[%s8441_s29 + $0x25c] ss:$20 sps:$4 sm:$0xff]   ;;  %v6273_v10 = vld [vmem:[%s8441_s29 + $0x260] ss:$20 sps:$4 sm:$0xff]   ;;  %v372_v14 = vcombine.high %v370_v11, %v370_v11  ;;  %v7027_v19 = vrot.slane %v370_v11, %v362_v49 }
  0x1d   :  { %v6270_v7 = vld [vmem:[%s8441_s29 + $0x264] ss:$20 sps:$4 sm:$0xff]   ;;  %v6279_v13 = vld [vmem:[%s8441_s29 + $0x28c] ss:$20 sps:$4 sm:$0xff]   ;;  %v6277_v17 = vld [vmem:[%s8441_s29 + $0x288] ss:$20 sps:$4 sm:$0xff]  }
  0x1e   :  { %1699 = vmatpush1.bf16.msra.mxu0 %v6212_v22  ;;  %1863 = vmatpush1.bf16.msra.mxu1 %v6213_v23  ;;  %v6272_v9 = vld [vmem:[%s8441_s29 + $0x258] ss:$20 sps:$4 sm:$0xff]   ;;  %v6274_v15 = vld [vmem:[%s8441_s29 + $0x280] ss:$20 sps:$4 sm:$0xff]   ;;  %v7025_v18 = vrot.slane %v372_v14, %v362_v49  ;;  %v7037_v22 = vcombine.high %v6968_v60, %v6968_v60  ;;  %v6280_v23 = vld [vmem:[%s8441_s29 + $0x2a8] ss:$20 sps:$4 sm:$0xff]  }
  0x1f   :  { %1700 = vmatprep.subr.bf16.mxu0 %v6214_v24  ;;  %1864 = vmatprep.subr.bf16.mxu1 %v6216_v25  ;;  %v6276_v12 = vld [vmem:[%s8441_s29 + $0x284] ss:$20 sps:$4 sm:$0xff]   ;;  %v6282_v20 = vld [vmem:[%s8441_s29 + $0x2ac] ss:$20 sps:$4 sm:$0xff]   ;;  %v6285_v21 = vld [vmem:[%s8441_s29 + $0x2b4] ss:$20 sps:$4 sm:$0xff]  }
  0x20   :  { %1720 = vmatprep.mubr.bf16.mxu0 %v6968_v60  ;;  %1884 = vmatprep.mubr.bf16.mxu1 %v6968_v60  ;;  %v6283_v24 = vld [vmem:[%s8441_s29 + $0x2b0] ss:$20 sps:$4 sm:$0xff]   ;;  %v6288_v25 = vld [vmem:[%s8441_s29 + $0x2d4] ss:$20 sps:$4 sm:$0xff]   ;;  %v6306_v37 = vld [vmem:[%s8441_s29 + $0x34c] ss:$20 sps:$4 sm:$0xff]  }
  0x21   :  { %v6301_v36 = vld [vmem:[%s8441_s29 + $0x328] ss:$20 sps:$4 sm:$0xff]   ;;  %v6319_v49 = vld [vmem:[%s8441_s29 + $0x3a0] ss:$20 sps:$4 sm:$0xff]   ;;  %v6361_v14 = vld [vmem:[%s8441_s29 + $0x4b8] ss:$20 sps:$4 sm:$0xff]  }
  0x22   :  { %1701 = vmatpush1.bf16.msra.mxu0 %v6218_v26  ;;  %1865 = vmatpush1.bf16.msra.mxu1 %v6219_v27  ;;  %v6291_v26 = vld [vmem:[%s8441_s29 + $0x2dc] ss:$20 sps:$4 sm:$0xff]   ;;  %v6309_v38 = vld [vmem:[%s8441_s29 + $0x354] ss:$20 sps:$4 sm:$0xff]   ;;  %v6330_v54 = vld [vmem:[%s8441_s29 + $0x3ec] ss:$20 sps:$4 sm:$0xff]  }
  0x23   :  { %1702 = vmatprep.subr.bf16.mxu0 %v6220_v28  ;;  %1866 = vmatprep.subr.bf16.mxu1 %v6222_v29  ;;  %v6286_v27 = vld [vmem:[%s8441_s29 + $0x2d0] ss:$20 sps:$4 sm:$0xff]   ;;  %v6289_v28 = vld [vmem:[%s8441_s29 + $0x2d8] ss:$20 sps:$4 sm:$0xff]   ;;  %v6322_v52 = vld [vmem:[%s8441_s29 + $0x3c0] ss:$20 sps:$4 sm:$0xff]  }
  0x24   :  { %v6294_v29 = vld [vmem:[%s8441_s29 + $0x2fc] ss:$20 sps:$4 sm:$0xff]   ;;  %v6336_v58 = vld [vmem:[%s8441_s29 + $0x414] ss:$20 sps:$4 sm:$0xff]  }
  0x25   :  { %v6315_v42 = vld [vmem:[%s8441_s29 + $0x37c] ss:$20 sps:$4 sm:$0xff]   ;;  %v6357_v8 = vld [vmem:[%s8441_s29 + $0x494] ss:$20 sps:$4 sm:$0xff]  }
  0x26   :  { %1703 = vmatpush1.bf16.msra.mxu0 %v6224_v30  ;;  %1867 = vmatpush1.bf16.msra.mxu1 %v6225_v31  ;;  %v6297_v30 = vld [vmem:[%s8441_s29 + $0x304] ss:$20 sps:$4 sm:$0xff]   ;;  %v6360_v11 = vld [vmem:[%s8441_s29 + $0x4b4] ss:$20 sps:$4 sm:$0xff]  }
  0x27   :  { %1704 = vmatprep.subr.bf16.mxu0 %v6226_v32  ;;  %1868 = vmatprep.subr.bf16.mxu1 %v6228_v33  ;;  %v6292_v31 = vld [vmem:[%s8441_s29 + $0x2f8] ss:$20 sps:$4 sm:$0xff]   ;;  %v6295_v32 = vld [vmem:[%s8441_s29 + $0x300] ss:$20 sps:$4 sm:$0xff]  }
  0x28   :  { %v6300_v33 = vld [vmem:[%s8441_s29 + $0x324] ss:$20 sps:$4 sm:$0xff]  }
  0x2a   :  { %1705 = vmatpush1.bf16.msra.mxu0 %v6230_v34  ;;  %1869 = vmatpush1.bf16.msra.mxu1 %v6231_v35  ;;  %v6303_v34 = vld [vmem:[%s8441_s29 + $0x32c] ss:$20 sps:$4 sm:$0xff]  }
  0x2b   :  { %1706 = vmatprep.subr.bf16.mxu0 %v6232_v39  ;;  %1870 = vmatprep.subr.bf16.mxu1 %v6234_v40  ;;  %v6298_v35 = vld [vmem:[%s8441_s29 + $0x320] ss:$20 sps:$4 sm:$0xff]   ;;  %v6304_v39 = vld [vmem:[%s8441_s29 + $0x348] ss:$20 sps:$4 sm:$0xff]   ;;  %v6307_v40 = vld [vmem:[%s8441_s29 + $0x350] ss:$20 sps:$4 sm:$0xff]  }
  0x2e   :  { %1707 = vmatpush1.bf16.msra.mxu0 %v6236_v41  ;;  %1871 = vmatpush1.bf16.msra.mxu1 %v6237_v44  ;;  %v6312_v41 = vld [vmem:[%s8441_s29 + $0x374] ss:$20 sps:$4 sm:$0xff]   ;;  %v6310_v44 = vld [vmem:[%s8441_s29 + $0x370] ss:$20 sps:$4 sm:$0xff]  }
  0x2f   :  { %1708 = vmatprep.subr.bf16.mxu0 %v6238_v45  ;;  %1872 = vmatprep.subr.bf16.mxu1 %v6240_v46  ;;  %v6313_v45 = vld [vmem:[%s8441_s29 + $0x378] ss:$20 sps:$4 sm:$0xff]   ;;  %v6318_v46 = vld [vmem:[%s8441_s29 + $0x39c] ss:$20 sps:$4 sm:$0xff]  }
  0x32   :  { %1709 = vmatpush1.bf16.msra.mxu0 %v6242_v47  ;;  %1873 = vmatpush1.bf16.msra.mxu1 %v6243_v48  ;;  %v6321_v47 = vld [vmem:[%s8441_s29 + $0x3a4] ss:$20 sps:$4 sm:$0xff]  }
  0x33   :  { %1710 = vmatprep.subr.bf16.mxu0 %v6244_v50  ;;  %1874 = vmatprep.subr.bf16.mxu1 %v6246_v51  ;;  %v6316_v48 = vld [vmem:[%s8441_s29 + $0x398] ss:$20 sps:$4 sm:$0xff]  }
  0x34   :  { %v6324_v50 = vld [vmem:[%s8441_s29 + $0x3c4] ss:$20 sps:$4 sm:$0xff]   ;;  %v6327_v51 = vld [vmem:[%s8441_s29 + $0x3cc] ss:$20 sps:$4 sm:$0xff]  }
  0x36   :  { %1711 = vmatpush1.bf16.msra.mxu0 %v6248_v53  ;;  %1875 = vmatpush1.bf16.msra.mxu1 %v6249_v55  ;;  %v6325_v53 = vld [vmem:[%s8441_s29 + $0x3c8] ss:$20 sps:$4 sm:$0xff]  }
  0x37   :  { %1712 = vmatprep.subr.bf16.mxu0 %v6250_v56  ;;  %1876 = vmatprep.subr.bf16.mxu1 %v6252_v57  ;;  %v6333_v55 = vld [vmem:[%s8441_s29 + $0x3f4] ss:$20 sps:$4 sm:$0xff]   ;;  %v6331_v57 = vld [vmem:[%s8441_s29 + $0x3f0] ss:$20 sps:$4 sm:$0xff]  }
  0x38   :  { %v6328_v56 = vld [vmem:[%s8441_s29 + $0x3e8] ss:$20 sps:$4 sm:$0xff]  }
  0x3a   :  { %1713 = vmatpush1.bf16.msra.mxu0 %v6254_v59  ;;  %1877 = vmatpush1.bf16.msra.mxu1 %v6255_v61  ;;  %v6339_v59 = vld [vmem:[%s8441_s29 + $0x41c] ss:$20 sps:$4 sm:$0xff]  }
  0x3b   :  { %1714 = vmatprep.subr.bf16.mxu0 %v6256_v62  ;;  %1878 = vmatprep.subr.bf16.mxu1 %v6258_v63  ;;  %v6334_v61 = vld [vmem:[%s8441_s29 + $0x410] ss:$20 sps:$4 sm:$0xff]   ;;  %v6337_v62 = vld [vmem:[%s8441_s29 + $0x418] ss:$20 sps:$4 sm:$0xff]  }
  0x3c   :  { %v6342_v63 = vld [vmem:[%s8441_s29 + $0x43c] ss:$20 sps:$4 sm:$0xff]  }
  0x3e   :  { %1715 = vmatpush1.bf16.msra.mxu0 %v6260_v0  ;;  %1879 = vmatpush1.bf16.msra.mxu1 %v6261_v1  ;;  %v6345_v0 = vld [vmem:[%s8441_s29 + $0x444] ss:$20 sps:$4 sm:$0xff]  }
  0x3f   :  { %1716 = vmatprep.subr.bf16.mxu0 %v6262_v2  ;;  %1880 = vmatprep.subr.bf16.mxu1 %v6264_v3  ;;  %v6340_v1 = vld [vmem:[%s8441_s29 + $0x438] ss:$20 sps:$4 sm:$0xff]   ;;  %v6343_v2 = vld [vmem:[%s8441_s29 + $0x440] ss:$20 sps:$4 sm:$0xff]  }
  0x40   :  { %v6348_v3 = vld [vmem:[%s8441_s29 + $0x464] ss:$20 sps:$4 sm:$0xff]  }
  0x42   :  { %1717 = vmatpush1.bf16.msra.mxu0 %v6266_v4  ;;  %1881 = vmatpush1.bf16.msra.mxu1 %v6267_v5  ;;  %v6351_v4 = vld [vmem:[%s8441_s29 + $0x46c] ss:$20 sps:$4 sm:$0xff]  }
  0x43   :  { %1718 = vmatprep.subr.bf16.mxu0 %v6268_v6  ;;  %1882 = vmatprep.subr.bf16.mxu1 %v6270_v7  ;;  %v6346_v5 = vld [vmem:[%s8441_s29 + $0x460] ss:$20 sps:$4 sm:$0xff]   ;;  %v6349_v6 = vld [vmem:[%s8441_s29 + $0x468] ss:$20 sps:$4 sm:$0xff]  }
  0x44   :  { %v6354_v7 = vld [vmem:[%s8441_s29 + $0x48c] ss:$20 sps:$4 sm:$0xff]  }
  0x46   :  { %1719 = vmatpush1.bf16.msra.mxu0 %v6272_v9  ;;  %1883 = vmatpush1.bf16.msra.mxu1 %v6273_v10  ;;  %v6352_v9 = vld [vmem:[%s8441_s29 + $0x488] ss:$20 sps:$4 sm:$0xff]   ;;  %v6355_v10 = vld [vmem:[%s8441_s29 + $0x490] ss:$20 sps:$4 sm:$0xff]  }
  0x47   :  { %1729 = vmatprep.subr.bf16.mxu0 %v6276_v12  ;;  %1893 = vmatprep.subr.bf16.mxu1 %v6279_v13  ;;  %v6363_v12 = vld [vmem:[%s8441_s29 + $0x4bc] ss:$20 sps:$4 sm:$0xff]  }
  0x48   :  { %v6358_v13 = vld [vmem:[%s8441_s29 + $0x4b0] ss:$20 sps:$4 sm:$0xff]  }
  0x49   :  { %1721 = vmatmul.mubr.bf16.vlgmr.msra.gmra.mrb[0].mxu0 %v7020_v16  ;;  %1885 = vmatmul.mubr.bf16.vlgmr.msra.gmra.mrb[0].mxu1 %v7020_v16 }
  0x4a   :  { %1730 = vmatpush1.bf16.msra.mxu0 %v6274_v15  ;;  %1894 = vmatpush1.bf16.msra.mxu1 %v6277_v17  ;;  %v6366_v15 = vld [vmem:[%s8441_s29 + $0x4dc] ss:$20 sps:$4 sm:$0xff]   ;;  %v6369_v17 = vld [vmem:[%s8441_s29 + $0x4e4] ss:$20 sps:$4 sm:$0xff]  }
  0x4b   :  { %1731 = vmatprep.subr.bf16.mxu0 %v6282_v20  ;;  %1895 = vmatprep.subr.bf16.mxu1 %v6285_v21  ;;  %v6364_v20 = vld [vmem:[%s8441_s29 + $0x4d8] ss:$20 sps:$4 sm:$0xff]   ;;  %v6367_v21 = vld [vmem:[%s8441_s29 + $0x4e0] ss:$20 sps:$4 sm:$0xff]  }
  0x4c   :  { %1761 = vmatprep.mubr.bf16.mxu0 %v7037_v22  ;;  %1925 = vmatprep.mubr.bf16.mxu1 %v7037_v22 }
  0x4e   :  { %1732 = vmatpush1.bf16.msra.mxu0 %v6280_v23  ;;  %1896 = vmatpush1.bf16.msra.mxu1 %v6283_v24  ;;  %v6372_v23 = vld [vmem:[%s8441_s29 + $0x504] ss:$20 sps:$4 sm:$0xff]   ;;  %v6375_v24 = vld [vmem:[%s8441_s29 + $0x50c] ss:$20 sps:$4 sm:$0xff]  }
  0x4f   :  { %1733 = vmatprep.subr.bf16.mxu0 %v6288_v25  ;;  %1897 = vmatprep.subr.bf16.mxu1 %v6291_v26  ;;  %v6370_v25 = vld [vmem:[%s8441_s29 + $0x500] ss:$20 sps:$4 sm:$0xff]   ;;  %v7228_v26 = vcombine.high %v7020_v16, %v7020_v16 }
  0x52   :  { %1734 = vmatpush1.bf16.msra.mxu0 %v6286_v27  ;;  %1898 = vmatpush1.bf16.msra.mxu1 %v6289_v28  ;;  %v6373_v27 = vld [vmem:[%s8441_s29 + $0x508] ss:$20 sps:$4 sm:$0xff]   ;;  %v6378_v28 = vld [vmem:[%s8441_s29 + $0x52c] ss:$20 sps:$4 sm:$0xff]  }
  0x53   :  { %1735 = vmatprep.subr.bf16.mxu0 %v6294_v29  ;;  %1899 = vmatprep.subr.bf16.mxu1 %v6297_v30  ;;  %v6381_v29 = vld [vmem:[%s8441_s29 + $0x534] ss:$20 sps:$4 sm:$0xff]  }
  0x54   :  { %v6376_v30 = vld [vmem:[%s8441_s29 + $0x528] ss:$20 sps:$4 sm:$0xff]  }
  0x56   :  { %1736 = vmatpush1.bf16.msra.mxu0 %v6292_v31  ;;  %1900 = vmatpush1.bf16.msra.mxu1 %v6295_v32  ;;  %v6379_v31 = vld [vmem:[%s8441_s29 + $0x530] ss:$20 sps:$4 sm:$0xff]   ;;  %v6384_v32 = vld [vmem:[%s8441_s29 + $0x554] ss:$20 sps:$4 sm:$0xff]  }
  0x57   :  { %1737 = vmatprep.subr.bf16.mxu0 %v6300_v33  ;;  %1901 = vmatprep.subr.bf16.mxu1 %v6303_v34  ;;  %v6387_v33 = vld [vmem:[%s8441_s29 + $0x55c] ss:$20 sps:$4 sm:$0xff]  }
  0x58   :  { %v6382_v34 = vld [vmem:[%s8441_s29 + $0x550] ss:$20 sps:$4 sm:$0xff]  }
  0x5a   :  { %1738 = vmatpush1.bf16.msra.mxu0 %v6298_v35  ;;  %1902 = vmatpush1.bf16.msra.mxu1 %v6301_v36  ;;  %v6385_v35 = vld [vmem:[%s8441_s29 + $0x558] ss:$20 sps:$4 sm:$0xff]   ;;  %v6390_v36 = vld [vmem:[%s8441_s29 + $0x57c] ss:$20 sps:$4 sm:$0xff]  }
  0x5b   :  { %1739 = vmatprep.subr.bf16.mxu0 %v6306_v37  ;;  %1903 = vmatprep.subr.bf16.mxu1 %v6309_v38  ;;  %v6393_v37 = vld [vmem:[%s8441_s29 + $0x584] ss:$20 sps:$4 sm:$0xff]  }
  0x5c   :  { %v6388_v38 = vld [vmem:[%s8441_s29 + $0x578] ss:$20 sps:$4 sm:$0xff]  }
  0x5e   :  { %1740 = vmatpush1.bf16.msra.mxu0 %v6304_v39  ;;  %1904 = vmatpush1.bf16.msra.mxu1 %v6307_v40  ;;  %v6391_v39 = vld [vmem:[%s8441_s29 + $0x580] ss:$20 sps:$4 sm:$0xff]   ;;  %v6396_v40 = vld [vmem:[%s8441_s29 + $0x5a4] ss:$20 sps:$4 sm:$0xff]  }
  0x5f   :  { %1741 = vmatprep.subr.bf16.mxu0 %v6312_v41  ;;  %1905 = vmatprep.subr.bf16.mxu1 %v6315_v42  ;;  %v6399_v41 = vld [vmem:[%s8441_s29 + $0x5ac] ss:$20 sps:$4 sm:$0xff]  }
  0x60   :  { %v6394_v42 = vld [vmem:[%s8441_s29 + $0x5a0] ss:$20 sps:$4 sm:$0xff]  }
  0x62   :  { %1742 = vmatpush1.bf16.msra.mxu0 %v6310_v44  ;;  %1906 = vmatpush1.bf16.msra.mxu1 %v6313_v45  ;;  %v6397_v44 = vld [vmem:[%s8441_s29 + $0x5a8] ss:$20 sps:$4 sm:$0xff]   ;;  %v6402_v45 = vld [vmem:[%s8441_s29 + $0x5cc] ss:$20 sps:$4 sm:$0xff]  }
  0x63   :  { %1743 = vmatprep.subr.bf16.mxu0 %v6318_v46  ;;  %1907 = vmatprep.subr.bf16.mxu1 %v6321_v47  ;;  %v6405_v46 = vld [vmem:[%s8441_s29 + $0x5d4] ss:$20 sps:$4 sm:$0xff]  }
  0x64   :  { %v6400_v47 = vld [vmem:[%s8441_s29 + $0x5c8] ss:$20 sps:$4 sm:$0xff]  }
  0x66   :  { %1744 = vmatpush1.bf16.msra.mxu0 %v6316_v48  ;;  %1908 = vmatpush1.bf16.msra.mxu1 %v6319_v49  ;;  %v6403_v48 = vld [vmem:[%s8441_s29 + $0x5d0] ss:$20 sps:$4 sm:$0xff]   ;;  %v6408_v49 = vld [vmem:[%s8441_s29 + $0x5f4] ss:$20 sps:$4 sm:$0xff]  }
  0x67   :  { %1745 = vmatprep.subr.bf16.mxu0 %v6324_v50  ;;  %1909 = vmatprep.subr.bf16.mxu1 %v6327_v51  ;;  %v6411_v50 = vld [vmem:[%s8441_s29 + $0x5fc] ss:$20 sps:$4 sm:$0xff]  }
  0x68   :  { %v6406_v51 = vld [vmem:[%s8441_s29 + $0x5f0] ss:$20 sps:$4 sm:$0xff]  }
  0x6a   :  { %1746 = vmatpush1.bf16.msra.mxu0 %v6322_v52  ;;  %1910 = vmatpush1.bf16.msra.mxu1 %v6325_v53  ;;  %v6409_v52 = vld [vmem:[%s8441_s29 + $0x5f8] ss:$20 sps:$4 sm:$0xff]   ;;  %v6414_v53 = vld [vmem:[%s8441_s29 + $0x61c] ss:$20 sps:$4 sm:$0xff]  }
  0x6b   :  { %1747 = vmatprep.subr.bf16.mxu0 %v6330_v54  ;;  %1911 = vmatprep.subr.bf16.mxu1 %v6333_v55  ;;  %v6417_v54 = vld [vmem:[%s8441_s29 + $0x624] ss:$20 sps:$4 sm:$0xff]  }
  0x6c   :  { %v6412_v55 = vld [vmem:[%s8441_s29 + $0x618] ss:$20 sps:$4 sm:$0xff]  }
  0x6e   :  { %1748 = vmatpush1.bf16.msra.mxu0 %v6328_v56  ;;  %1912 = vmatpush1.bf16.msra.mxu1 %v6331_v57  ;;  %v6415_v56 = vld [vmem:[%s8441_s29 + $0x620] ss:$20 sps:$4 sm:$0xff]   ;;  %v6420_v57 = vld [vmem:[%s8441_s29 + $0x644] ss:$20 sps:$4 sm:$0xff]  }
  0x6f   :  { %1749 = vmatprep.subr.bf16.mxu0 %v6336_v58  ;;  %1913 = vmatprep.subr.bf16.mxu1 %v6339_v59  ;;  %v6423_v58 = vld [vmem:[%s8441_s29 + $0x64c] ss:$20 sps:$4 sm:$0xff]  }
  0x70   :  { %v6418_v59 = vld [vmem:[%s8441_s29 + $0x640] ss:$20 sps:$4 sm:$0xff]  }
  0x72   :  { %1750 = vmatpush1.bf16.msra.mxu0 %v6334_v61  ;;  %1914 = vmatpush1.bf16.msra.mxu1 %v6337_v62  ;;  %v6421_v61 = vld [vmem:[%s8441_s29 + $0x648] ss:$20 sps:$4 sm:$0xff]   ;;  %v6426_v62 = vld [vmem:[%s8441_s29 + $0x66c] ss:$20 sps:$4 sm:$0xff]  }
  0x73   :  { %1751 = vmatprep.subr.bf16.mxu0 %v6342_v63  ;;  %1915 = vmatprep.subr.bf16.mxu1 %v6345_v0  ;;  %v6429_v63 = vld [vmem:[%s8441_s29 + $0x674] ss:$20 sps:$4 sm:$0xff]  }
  0x74   :  { %v6424_v0 = vld [vmem:[%s8441_s29 + $0x668] ss:$20 sps:$4 sm:$0xff]  }
  0x76   :  { %1752 = vmatpush1.bf16.msra.mxu0 %v6340_v1  ;;  %1916 = vmatpush1.bf16.msra.mxu1 %v6343_v2  ;;  %v6427_v1 = vld [vmem:[%s8441_s29 + $0x670] ss:$20 sps:$4 sm:$0xff]   ;;  %v6432_v2 = vld [vmem:[%s8441_s29 + $0x694] ss:$20 sps:$4 sm:$0xff]  }
  0x77   :  { %1753 = vmatprep.subr.bf16.mxu0 %v6348_v3  ;;  %1917 = vmatprep.subr.bf16.mxu1 %v6351_v4  ;;  %v6435_v3 = vld [vmem:[%s8441_s29 + $0x69c] ss:$20 sps:$4 sm:$0xff]  }
  0x78   :  { %v6430_v4 = vld [vmem:[%s8441_s29 + $0x690] ss:$20 sps:$4 sm:$0xff]  }
  0x7a   :  { %1754 = vmatpush1.bf16.msra.mxu0 %v6346_v5  ;;  %1918 = vmatpush1.bf16.msra.mxu1 %v6349_v6  ;;  %v6433_v5 = vld [vmem:[%s8441_s29 + $0x698] ss:$20 sps:$4 sm:$0xff]   ;;  %v6438_v6 = vld [vmem:[%s8441_s29 + $0x6bc] ss:$20 sps:$4 sm:$0xff]  }
  0x7b   :  { %1755 = vmatprep.subr.bf16.mxu0 %v6354_v7  ;;  %1919 = vmatprep.subr.bf16.mxu1 %v6357_v8  ;;  %v6441_v7 = vld [vmem:[%s8441_s29 + $0x6c4] ss:$20 sps:$4 sm:$0xff]  }
  0x7c   :  { %v6436_v8 = vld [vmem:[%s8441_s29 + $0x6b8] ss:$20 sps:$4 sm:$0xff]  }
  0x7e   :  { %1756 = vmatpush1.bf16.msra.mxu0 %v6352_v9  ;;  %1920 = vmatpush1.bf16.msra.mxu1 %v6355_v10  ;;  %v6439_v9 = vld [vmem:[%s8441_s29 + $0x6c0] ss:$20 sps:$4 sm:$0xff]   ;;  %v6444_v10 = vld [vmem:[%s8441_s29 + $0x6e4] ss:$20 sps:$4 sm:$0xff]  }
  0x7f   :  { %1757 = vmatprep.subr.bf16.mxu0 %v6360_v11  ;;  %1921 = vmatprep.subr.bf16.mxu1 %v6363_v12  ;;  %v6447_v11 = vld [vmem:[%s8441_s29 + $0x6ec] ss:$20 sps:$4 sm:$0xff]  }
  0x80   :  { %v6442_v12 = vld [vmem:[%s8441_s29 + $0x6e0] ss:$20 sps:$4 sm:$0xff]  }
  0x82   :  { %1758 = vmatpush1.bf16.msra.mxu0 %v6358_v13  ;;  %1922 = vmatpush1.bf16.msra.mxu1 %v6361_v14  ;;  %v6445_v13 = vld [vmem:[%s8441_s29 + $0x6e8] ss:$20 sps:$4 sm:$0xff]   ;;  %v6450_v14 = vld [vmem:[%s8441_s29 + $0x70c] ss:$20 sps:$4 sm:$0xff]  }
  0x83   :  { %1759 = vmatprep.subr.bf16.mxu0 %v6366_v15  ;;  %1923 = vmatprep.subr.bf16.mxu1 %v6369_v17  ;;  %v6453_v15 = vld [vmem:[%s8441_s29 + $0x714] ss:$20 sps:$4 sm:$0xff]  }
  0x84   :  { %v6448_v17 = vld [vmem:[%s8441_s29 + $0x708] ss:$20 sps:$4 sm:$0xff]  }
  0x86   :  { %1760 = vmatpush1.bf16.msra.mxu0 %v6364_v20  ;;  %1924 = vmatpush1.bf16.msra.mxu1 %v6367_v21  ;;  %v6451_v20 = vld [vmem:[%s8441_s29 + $0x710] ss:$20 sps:$4 sm:$0xff]   ;;  %v6456_v21 = vld [vmem:[%s8441_s29 + $0x734] ss:$20 sps:$4 sm:$0xff]  }
  0x87   :  { %1770 = vmatprep.subr.bf16.mxu0 %v6372_v23  ;;  %1934 = vmatprep.subr.bf16.mxu1 %v6375_v24  ;;  %v6459_v23 = vld [vmem:[%s8441_s29 + $0x73c] ss:$20 sps:$4 sm:$0xff]  }
  0x88   :  { %v6454_v24 = vld [vmem:[%s8441_s29 + $0x730] ss:$20 sps:$4 sm:$0xff]  }
  0x89   :  { %1762 = vmatmul.mubr.bf16.vlgmr.msra.gmra.mrb[0].mxu0 %v7228_v26  ;;  %1926 = vmatmul.mubr.bf16.vlgmr.msra.gmra.mrb[0].mxu1 %v7228_v26 }
  0x8a   :  { %1771 = vmatpush1.bf16.msra.mxu0 %v6370_v25  ;;  %1935 = vmatpush1.bf16.msra.mxu1 %v6373_v27  ;;  %v6457_v25 = vld [vmem:[%s8441_s29 + $0x738] ss:$20 sps:$4 sm:$0xff]   ;;  %v6462_v27 = vld [vmem:[%s8441_s29 + $0x75c] ss:$20 sps:$4 sm:$0xff]  }
  0x8b   :  { %1772 = vmatprep.subr.bf16.mxu0 %v6378_v28  ;;  %1936 = vmatprep.subr.bf16.mxu1 %v6381_v29  ;;  %v6465_v28 = vld [vmem:[%s8441_s29 + $0x764] ss:$20 sps:$4 sm:$0xff]  }
  0x8c   :  { %1802 = vmatprep.mubr.bf16.mxu0 %v7025_v18  ;;  %1966 = vmatprep.mubr.bf16.mxu1 %v7025_v18  ;;  %v6460_v29 = vld [vmem:[%s8441_s29 + $0x758] ss:$20 sps:$4 sm:$0xff]  }
  0x8e   :  { %1773 = vmatpush1.bf16.msra.mxu0 %v6376_v30  ;;  %1937 = vmatpush1.bf16.msra.mxu1 %v6379_v31  ;;  %v6463_v30 = vld [vmem:[%s8441_s29 + $0x760] ss:$20 sps:$4 sm:$0xff]   ;;  %v6469_v31 = vld [vmem:[%s8441_s29 + $0x784] ss:$20 sps:$4 sm:$0xff]  }
  0x8f   :  { %1774 = vmatprep.subr.bf16.mxu0 %v6384_v32  ;;  %1938 = vmatprep.subr.bf16.mxu1 %v6387_v33  ;;  %v6472_v32 = vld [vmem:[%s8441_s29 + $0x78c] ss:$20 sps:$4 sm:$0xff]  }
  0x90   :  { %v6467_v33 = vld [vmem:[%s8441_s29 + $0x780] ss:$20 sps:$4 sm:$0xff]  }
  0x92   :  { %1775 = vmatpush1.bf16.msra.mxu0 %v6382_v34  ;;  %1939 = vmatpush1.bf16.msra.mxu1 %v6385_v35  ;;  %v6470_v34 = vld [vmem:[%s8441_s29 + $0x788] ss:$20 sps:$4 sm:$0xff]   ;;  %v6473_v35 = vld [vmem:[%s8441_s29 + $0x150] ss:$20 sps:$4 sm:$0xff]  }
  0x93   :  { %1776 = vmatprep.subr.bf16.mxu0 %v6390_v36  ;;  %1940 = vmatprep.subr.bf16.mxu1 %v6393_v37  ;;  %v6481_v36 = vld [vmem:[%s8441_s29 + $0x3d0] ss:$20 sps:$4 sm:$0xff]   ;;  %v6709_v37 = vmov 0  }
  0x96   :  { %1777 = vmatpush1.bf16.msra.mxu0 %v6388_v38  ;;  %1941 = vmatpush1.bf16.msra.mxu1 %v6391_v39  ;;  %v7441_v38 = vcombine.high %v7027_v19, %v7027_v19  ;;  %v6474_v39 = vld [vmem:[%s8441_s29 + $0x10] ss:$20 sps:$4 sm:$0xff]  }
  0x97   :  { %1778 = vmatprep.subr.bf16.mxu0 %v6396_v40  ;;  %1942 = vmatprep.subr.bf16.mxu1 %v6399_v41  ;;  %v6483_v40 = vld [vmem:[%s8441_s29 + $0x290] ss:$20 sps:$4 sm:$0xff]   ;;  %v6475_v41 = vld [vmem:[%s8441_s29 + $0x178] ss:$20 sps:$4 sm:$0xff]  }
  0x9a   :  { %1779 = vmatpush1.bf16.msra.mxu0 %v6394_v42  ;;  %1943 = vmatpush1.bf16.msra.mxu1 %v6397_v44  ;;  %v6485_v42 = vld [vmem:[%s8441_s29 + $0x3f8] ss:$20 sps:$4 sm:$0xff]  }
  0x9b   :  { %1780 = vmatprep.subr.bf16.mxu0 %v6402_v45  ;;  %1944 = vmatprep.subr.bf16.mxu1 %v6405_v46  ;;  %v6476_v44 = vld [vmem:[%s8441_s29 + $0x38] ss:$20 sps:$4 sm:$0xff]   ;;  %v6477_v45 = vld [vmem:[%s8441_s29 + $0x1a0] ss:$20 sps:$4 sm:$0xff]  }
  0x9c   :  { %v6487_v46 = vld [vmem:[%s8441_s29 + $0x2b8] ss:$20 sps:$4 sm:$0xff]  }
  0x9e   :  { %1781 = vmatpush1.bf16.msra.mxu0 %v6400_v47  ;;  %1945 = vmatpush1.bf16.msra.mxu1 %v6403_v48  ;;  %v6489_v47 = vld [vmem:[%s8441_s29 + $0x420] ss:$20 sps:$4 sm:$0xff]  }
  0x9f   :  { %1782 = vmatprep.subr.bf16.mxu0 %v6408_v49  ;;  %1946 = vmatprep.subr.bf16.mxu1 %v6411_v50  ;;  %v6478_v48 = vld [vmem:[%s8441_s29 + $0x60] ss:$20 sps:$4 sm:$0xff]   ;;  %v6479_v49 = vld [vmem:[%s8441_s29 + $0x1c8] ss:$20 sps:$4 sm:$0xff]  }
  0xa0   :  { %v6491_v50 = vld [vmem:[%s8441_s29 + $0x2e0] ss:$20 sps:$4 sm:$0xff]  }
  0xa2   :  { %1783 = vmatpush1.bf16.msra.mxu0 %v6406_v51  ;;  %1947 = vmatpush1.bf16.msra.mxu1 %v6409_v52  ;;  %v6493_v51 = vld [vmem:[%s8441_s29 + $0x448] ss:$20 sps:$4 sm:$0xff]   ;;  %v6482_v52 = vld [vmem:[%s8441_s29 + $0x1f0] ss:$20 sps:$4 sm:$0xff]  }
  0xa3   :  { %1784 = vmatprep.subr.bf16.mxu0 %v6414_v53  ;;  %1948 = vmatprep.subr.bf16.mxu1 %v6417_v54  ;;  %v6497_v53 = vld [vmem:[%s8441_s29 + $0x470] ss:$20 sps:$4 sm:$0xff]  }
  0xa4   :  { %v6484_v54 = vld [vmem:[%s8441_s29 + $0xb0] ss:$20 sps:$4 sm:$0xff]  }
  0xa6   :  { %1785 = vmatpush1.bf16.msra.mxu0 %v6412_v55  ;;  %1949 = vmatpush1.bf16.msra.mxu1 %v6415_v56  ;;  %v6498_v55 = vld [vmem:[%s8441_s29 + $0x330] ss:$20 sps:$4 sm:$0xff]   ;;  %v6486_v56 = vld [vmem:[%s8441_s29 + $0x218] ss:$20 sps:$4 sm:$0xff]  }
  0xa7   :  { %1786 = vmatprep.subr.bf16.mxu0 %v6420_v57  ;;  %1950 = vmatprep.subr.bf16.mxu1 %v6423_v58  ;;  %v6501_v57 = vld [vmem:[%s8441_s29 + $0x498] ss:$20 sps:$4 sm:$0xff]  }
  0xa8   :  { %v6488_v58 = vld [vmem:[%s8441_s29 + $0xd8] ss:$20 sps:$4 sm:$0xff]  }
  0xaa   :  { %1787 = vmatpush1.bf16.msra.mxu0 %v6418_v59  ;;  %1951 = vmatpush1.bf16.msra.mxu1 %v6421_v61  ;;  %v6502_v59 = vld [vmem:[%s8441_s29 + $0x358] ss:$20 sps:$4 sm:$0xff]   ;;  %v6490_v61 = vld [vmem:[%s8441_s29 + $0x240] ss:$20 sps:$4 sm:$0xff]  }
  0xab   :  { %1788 = vmatprep.subr.bf16.mxu0 %v6426_v62  ;;  %1952 = vmatprep.subr.bf16.mxu1 %v6429_v63  ;;  %v6505_v62 = vld [vmem:[%s8441_s29 + $0x4c0] ss:$20 sps:$4 sm:$0xff]  }
  0xac   :  { %v6492_v63 = vld [vmem:[%s8441_s29 + $0x100] ss:$20 sps:$4 sm:$0xff]  }
  0xae   :  { %1789 = vmatpush1.bf16.msra.mxu0 %v6424_v0  ;;  %1953 = vmatpush1.bf16.msra.mxu1 %v6427_v1  ;;  %v6506_v0 = vld [vmem:[%s8441_s29 + $0x380] ss:$20 sps:$4 sm:$0xff]   ;;  %v6494_v1 = vld [vmem:[%s8441_s29 + $0x268] ss:$20 sps:$4 sm:$0xff]  }
  0xaf   :  { %1790 = vmatprep.subr.bf16.mxu0 %v6432_v2  ;;  %1954 = vmatprep.subr.bf16.mxu1 %v6435_v3  ;;  %v6509_v2 = vld [vmem:[%s8441_s29 + $0x4e8] ss:$20 sps:$4 sm:$0xff]  }
  0xb0   :  { %v6496_v3 = vld [vmem:[%s8441_s29 + $0x128] ss:$20 sps:$4 sm:$0xff]  }
  0xb2   :  { %1791 = vmatpush1.bf16.msra.mxu0 %v6430_v4  ;;  %1955 = vmatpush1.bf16.msra.mxu1 %v6433_v5  ;;  %v6510_v4 = vld [vmem:[%s8441_s29 + $0x3a8] ss:$20 sps:$4 sm:$0xff]   ;;  %v6499_v5 = vld [vmem:[%s8441_s29 + $0x650] ss:$20 sps:$4 sm:$0xff]  }
  0xb3   :  { %1792 = vmatprep.subr.bf16.mxu0 %v6438_v6  ;;  %1956 = vmatprep.subr.bf16.mxu1 %v6441_v7  ;;  %v6500_v6 = vld [vmem:[%s8441_s29 + $0x510] ss:$20 sps:$4 sm:$0xff]   ;;  %v6503_v7 = vld [vmem:[%s8441_s29 + $0x678] ss:$20 sps:$4 sm:$0xff]  }
  0xb6   :  { %1793 = vmatpush1.bf16.msra.mxu0 %v6436_v8  ;;  %1957 = vmatpush1.bf16.msra.mxu1 %v6439_v9  ;;  %v6521_v8 = vld [vmem:[%s8441_s29 + $0x790] ss:$20 sps:$4 sm:$0xff]  }
  0xb7   :  { %1794 = vmatprep.subr.bf16.mxu0 %v6444_v10  ;;  %1958 = vmatprep.subr.bf16.mxu1 %v6447_v11  ;;  %v6524_v9 = vld [vmem:[%s8443_s21 + $0x4] ss:$12 sps:$4 sm:$0xff]   ;;  %v6710_v10 = vmov 0.0   ;;  %v6504_v11 = vld [vmem:[%s8441_s29 + $0x538] ss:$20 sps:$4 sm:$0xff]  }
  0xba   :  { %1795 = vmatpush1.bf16.msra.mxu0 %v6442_v12  ;;  %1959 = vmatpush1.bf16.msra.mxu1 %v6445_v13  ;;  %v6507_v12 = vld [vmem:[%s8441_s29 + $0x6a0] ss:$20 sps:$4 sm:$0xff]  }
  0xbb   :  { %1796 = vmatprep.subr.bf16.mxu0 %v6450_v14  ;;  %1960 = vmatprep.subr.bf16.mxu1 %v6453_v15  ;;  %v6522_v13 = vld [vmem:[%s8443_s21] ss:$12 sps:$4 sm:$0xff]   ;;  %v6512_v14 = vld [vmem:[%s8441_s29 + $0x588] ss:$20 sps:$4 sm:$0xff]   ;;  %v6525_v15 = vld [vmem:[%s8443_s21 + $0x18] ss:$12 sps:$4 sm:$0xff]  }
  0xbe   :  { %1797 = vmatpush1.bf16.msra.mxu0 %v6448_v17  ;;  %1961 = vmatpush1.bf16.msra.mxu1 %v6451_v20  ;;  %v6513_v17 = vld [vmem:[%s8441_s29 + $0x6f0] ss:$20 sps:$4 sm:$0xff]   ;;  %v6530_v20 = vld [vmem:[%s8443_s21 + $0x34] ss:$12 sps:$4 sm:$0xff]  }
  0xbf   :  { %1798 = vmatprep.subr.bf16.mxu0 %v6456_v21  ;;  %1962 = vmatprep.subr.bf16.mxu1 %v6459_v23  ;;  %v6514_v21 = vld [vmem:[%s8441_s29 + $0x5b0] ss:$20 sps:$4 sm:$0xff]  }
  0xc0   :  { %v6528_v23 = vld [vmem:[%s8443_s21 + $0x30] ss:$12 sps:$4 sm:$0xff]  }
  0xc2   :  { %1799 = vmatpush1.bf16.msra.mxu0 %v6454_v24  ;;  %1963 = vmatpush1.bf16.msra.mxu1 %v6457_v25  ;;  %v6515_v24 = vld [vmem:[%s8441_s29 + $0x718] ss:$20 sps:$4 sm:$0xff]  }
  0xc3   :  { %1800 = vmatprep.subr.bf16.mxu0 %v6462_v27  ;;  %1964 = vmatprep.subr.bf16.mxu1 %v6465_v28  ;;  %v6533_v25 = vld [vmem:[%s8443_s21 + $0x4c] ss:$12 sps:$4 sm:$0xff]   ;;  %v6531_v28 = vld [vmem:[%s8443_s21 + $0x48] ss:$12 sps:$4 sm:$0xff]  }
  0xc4   :  { %v6516_v27 = vld [vmem:[%s8441_s29 + $0x5d8] ss:$20 sps:$4 sm:$0xff]  }
  0xc6   :  { %1801 = vmatpush1.bf16.msra.mxu0 %v6460_v29  ;;  %1965 = vmatpush1.bf16.msra.mxu1 %v6463_v30  ;;  %v6517_v29 = vld [vmem:[%s8441_s29 + $0x740] ss:$20 sps:$4 sm:$0xff]   ;;  %v6536_v30 = vld [vmem:[%s8443_s21 + $0x64] ss:$12 sps:$4 sm:$0xff]  }
  0xc7   :  { %1811 = vmatprep.subr.bf16.mxu0 %v6469_v31  ;;  %1975 = vmatprep.subr.bf16.mxu1 %v6472_v32  ;;  %v6518_v31 = vld [vmem:[%s8441_s29 + $0x600] ss:$20 sps:$4 sm:$0xff]  }
  0xc8   :  { %v6534_v32 = vld [vmem:[%s8443_s21 + $0x60] ss:$12 sps:$4 sm:$0xff]  }
  0xc9   :  { %1803 = vmatmul.mubr.bf16.vlgmr.msra.gmra.mrb[0].mxu0 %v7027_v19  ;;  %1967 = vmatmul.mubr.bf16.vlgmr.msra.gmra.mrb[0].mxu1 %v7027_v19 }
  0xca   :  { %1812 = vmatpush1.bf16.msra.mxu0 %v6467_v33  ;;  %1976 = vmatpush1.bf16.msra.mxu1 %v6470_v34  ;;  %v6519_v33 = vld [vmem:[%s8441_s29 + $0x768] ss:$20 sps:$4 sm:$0xff]  }
  0xcb   :  { %1843 = vmatprep.mubr.bf16.mxu0 %v6709_v37  ;;  %2007 = vmatprep.mubr.bf16.mxu1 %v6709_v37  ;;  %v6539_v34 = vld [vmem:[%s8443_s21 + $0x7c] ss:$12 sps:$4 sm:$0xff]  }
  0xcc   :  { %5503 = vmatprep.subr.bf16.mxu0 %v6473_v35  ;;  %5525 = vmatprep.subr.bf16.mxu1 %v6481_v36  ;;  %v6520_v35 = vld [vmem:[%s8441_s29 + $0x628] ss:$20 sps:$4 sm:$0xff]   ;;  %v6537_v36 = vld [vmem:[%s8443_s21 + $0x78] ss:$12 sps:$4 sm:$0xff]  }
  0xd5   :  { %5325 = vmatmul.mubr.msk.bf16.vlgmr.msra.gmra.mrb[0].mxu0 %vm1684_vm0, %v7441_v38  ;;  %5326 = vmatmul.mubr.msk.bf16.vlgmr.msra.gmra.mrb[0].mxu1 %vm1684_vm0, %v7441_v38 }
  0xd6   :  { %5504 = vmatpush3.bf16.msra.mxu0 %v6474_v39  ;;  %5526 = vmatpush3.bf16.msra.mxu1 %v6483_v40  ;;  %v6549_v39 = vld [vmem:[%s8443_s21 + $0xc8] ss:$12 sps:$4 sm:$0xff]   ;;  %v6540_v40 = vld [vmem:[%s8443_s21 + $0x90] ss:$12 sps:$4 sm:$0xff]  }
  0xd7   :  { %5505 = vmatprep.subr.bf16.mxu0 %v6475_v41  ;;  %5527 = vmatprep.subr.bf16.mxu1 %v6485_v42  ;;  %v6550_v41 = vld [vmem:[%s8443_s21 + $0x8] ss:$12 sps:$4 sm:$0xff]   ;;  %v6545_v42 = vld [vmem:[%s8443_s21 + $0xac] ss:$12 sps:$4 sm:$0xff]  }
  0xd8   :  { %2048 = vmatprep.mubr.bf16.mxu0 %v6968_v60  ;;  %2088 = vmatprep.mubr.bf16.mxu1 %v7037_v22  ;;  %v6480_v60 = vld [vmem:[%s8441_s29 + $0x88] ss:$20 sps:$4 sm:$0xff]  }
  0xd9   :  { %v6495_v22 = vld [vmem:[%s8441_s29 + $0x308] ss:$20 sps:$4 sm:$0xff]  }
  0xda   :  { %5506 = vmatpush3.bf16.msra.mxu0 %v6476_v44  ;;  %5528 = vmatpush3.bf16.msra.mxu1 %v6487_v46  ;;  %v6554_v44 = vld [vmem:[%s8443_s21 + $0xe0] ss:$12 sps:$4 sm:$0xff]  }
  0xdb   :  { %5507 = vmatprep.subr.bf16.mxu0 %v6477_v45  ;;  %5529 = vmatprep.subr.bf16.mxu1 %v6489_v47  ;;  %v6543_v45 = vld [vmem:[%s8443_s21 + $0xa8] ss:$12 sps:$4 sm:$0xff]   ;;  %v6555_v46 = vld [vmem:[%s8443_s21 + $0x20] ss:$12 sps:$4 sm:$0xff]   ;;  %v6548_v47 = vld [vmem:[%s8443_s21 + $0xc4] ss:$12 sps:$4 sm:$0xff]  }
  0xde   :  { %5508 = vmatpush3.bf16.msra.mxu0 %v6478_v48  ;;  %5530 = vmatpush3.bf16.msra.mxu1 %v6491_v50  ;;  %v6546_v48 = vld [vmem:[%s8443_s21 + $0xc0] ss:$12 sps:$4 sm:$0xff]   ;;  %v6553_v50 = vld [vmem:[%s8443_s21 + $0xdc] ss:$12 sps:$4 sm:$0xff]  }
  0xdf   :  { %5509 = vmatprep.subr.bf16.mxu0 %v6479_v49  ;;  %5531 = vmatprep.subr.bf16.mxu1 %v6493_v51  ;;  %v6560_v49 = vld [vmem:[%s8443_s21 + $0x38] ss:$12 sps:$4 sm:$0xff]   ;;  %v6564_v51 = vld [vmem:[%s8443_s21 + $0x110] ss:$12 sps:$4 sm:$0xff]  }
  0xe2   :  { %5510 = vmatpush3.bf16.msra.mxu0 %v6480_v60  ;;  %5532 = vmatpush3.bf16.msra.mxu1 %v6495_v22  ;;  %v6551_v60 = vld [vmem:[%s8443_s21 + $0xd8] ss:$12 sps:$4 sm:$0xff]   ;;  %v6565_v22 = vld [vmem:[%s8443_s21 + $0x50] ss:$12 sps:$4 sm:$0xff]  }
  0xe3   :  { %5511 = vmatprep.subr.bf16.mxu0 %v6482_v52  ;;  %5533 = vmatprep.subr.bf16.mxu1 %v6497_v53  ;;  %v6558_v52 = vld [vmem:[%s8443_s21 + $0xf4] ss:$12 sps:$4 sm:$0xff]  }
  0xe4   :  { %v6569_v53 = vld [vmem:[%s8443_s21 + $0x128] ss:$12 sps:$4 sm:$0xff]  }
  0xe6   :  { %5512 = vmatpush3.bf16.msra.mxu0 %v6484_v54  ;;  %5534 = vmatpush3.bf16.msra.mxu1 %v6498_v55  ;;  %v6556_v54 = vld [vmem:[%s8443_s21 + $0xf0] ss:$12 sps:$4 sm:$0xff]   ;;  %v6570_v55 = vld [vmem:[%s8443_s21 + $0x68] ss:$12 sps:$4 sm:$0xff]  }
  0xe7   :  { %5513 = vmatprep.subr.bf16.mxu0 %v6486_v56  ;;  %5535 = vmatprep.subr.bf16.mxu1 %v6501_v57  ;;  %v6563_v56 = vld [vmem:[%s8443_s21 + $0x10c] ss:$12 sps:$4 sm:$0xff]  }
  0xe8   :  { %v6574_v57 = vld [vmem:[%s8443_s21 + $0x140] ss:$12 sps:$4 sm:$0xff]  }
  0xea   :  { %5514 = vmatpush3.bf16.msra.mxu0 %v6488_v58  ;;  %5536 = vmatpush3.bf16.msra.mxu1 %v6502_v59  ;;  %v6561_v58 = vld [vmem:[%s8443_s21 + $0x108] ss:$12 sps:$4 sm:$0xff]   ;;  %v6575_v59 = vld [vmem:[%s8443_s21 + $0x80] ss:$12 sps:$4 sm:$0xff]  }
  0xeb   :  { %5515 = vmatprep.subr.bf16.mxu0 %v6490_v61  ;;  %5537 = vmatprep.subr.bf16.mxu1 %v6505_v62  ;;  %v6568_v61 = vld [vmem:[%s8443_s21 + $0x124] ss:$12 sps:$4 sm:$0xff]  }
  0xec   :  { %v6579_v62 = vld [vmem:[%s8443_s21 + $0x158] ss:$12 sps:$4 sm:$0xff]  }
  0xee   :  { %5516 = vmatpush3.bf16.msra.mxu0 %v6492_v63  ;;  %5538 = vmatpush3.bf16.msra.mxu1 %v6506_v0  ;;  %v6566_v63 = vld [vmem:[%s8443_s21 + $0x120] ss:$12 sps:$4 sm:$0xff]   ;;  %v6580_v0 = vld [vmem:[%s8443_s21 + $0x98] ss:$12 sps:$4 sm:$0xff]  }
  0xef   :  { %5517 = vmatprep.subr.bf16.mxu0 %v6494_v1  ;;  %5539 = vmatprep.subr.bf16.mxu1 %v6509_v2  ;;  %v6573_v1 = vld [vmem:[%s8443_s21 + $0x13c] ss:$12 sps:$4 sm:$0xff]  }
  0xf0   :  { %v6584_v2 = vld [vmem:[%s8443_s21 + $0x170] ss:$12 sps:$4 sm:$0xff]  }
  0xf2   :  { %5518 = vmatpush3.bf16.msra.mxu0 %v6496_v3  ;;  %5540 = vmatpush3.bf16.msra.mxu1 %v6510_v4  ;;  %v6571_v3 = vld [vmem:[%s8443_s21 + $0x138] ss:$12 sps:$4 sm:$0xff]   ;;  %v6585_v4 = vld [vmem:[%s8443_s21 + $0xb0] ss:$12 sps:$4 sm:$0xff]  }
  0xf3   :  { %5547 = vmatprep.subr.bf16.mxu0 %v6499_v5  ;;  %5796 = vmatprep.subr.bf16.mxu1 %v6710_v10  ;;  %v6578_v5 = vld [vmem:[%s8443_s21 + $0x154] ss:$12 sps:$4 sm:$0xff]  }
  0xf5   :  { %2049 = vmatmul.mubr.bf16.vlgmr.msra.gmra.mrb[4].mxu0 %v7020_v16  ;;  %2089 = vmatmul.mubr.bf16.vlgmr.msra.gmra.mrb[4].mxu1 %v7228_v26  ;;  %v6508_v16 = vld [vmem:[%s8441_s29 + $0x560] ss:$20 sps:$4 sm:$0xff]   ;;  %v6527_v26 = vld [vmem:[%s8443_s21 + $0x1c] ss:$12 sps:$4 sm:$0xff]  }
  0xf6   :  { %5548 = vmatpush3.bf16.msra.mxu0 %v6500_v6  ;;  %2128 = vmatprep.mubr.bf16.mxu0 %v7025_v18  ;;  %v6511_v18 = vld [vmem:[%s8441_s29 + $0x6c8] ss:$20 sps:$4 sm:$0xff]  }
  0xf7   :  { %5549 = vmatprep.subr.bf16.mxu0 %v6503_v7  ;;  %5797 = vmatpush3.bf16.msra.mxu1 %v6521_v8  ;;  %v6589_v6 = vld [vmem:[%s8443_s21 + $0x248] ss:$12 sps:$4 sm:$0xff]   ;;  %v6576_v7 = vld [vmem:[%s8443_s21 + $0x150] ss:$12 sps:$4 sm:$0xff]   ;;  %v6583_v8 = vld [vmem:[%s8443_s21 + $0x16c] ss:$12 sps:$4 sm:$0xff]  }
  0xf8   :  { %5798 = vmatprep.mubr.msk.bf16.mxu1 %vm6711_vm1, %v6710_v10  ;;  %2947 = vmatprep.subr.bf16.mxu1 %v6524_v9  ;;  %v6581_v9 = vld [vmem:[%s8443_s21 + $0x168] ss:$12 sps:$4 sm:$0xff]  }
  0xfa   :  { %5550 = vmatpush3.bf16.msra.mxu0 %v6504_v11  ;;  %v6588_v11 = vld [vmem:[%s8443_s21 + $0x184] ss:$12 sps:$4 sm:$0xff]  }
  0xfb   :  { %5551 = vmatprep.subr.bf16.mxu0 %v6507_v12 }
  0xfd   :  { %5799 = vmatmul.mubr.msk.bf16.vlgmr.msra.gmra.mrb[8].mxu1 %vm1684_vm0, %v7441_v38  ;;  %v6542_v38 = vld [vmem:[%s8443_s21 + $0x94] ss:$12 sps:$4 sm:$0xff]  }
  0xfe   :  { %5552 = vmatpush3.bf16.msra.mxu0 %v6508_v16  ;;  %2948 = vmatpush1.bf16.msra.mxu1 %v6522_v13 }
  0xff   :  { %5553 = vmatprep.subr.bf16.mxu0 %v6511_v18  ;;  %2949 = vmatprep.subr.bf16.mxu1 %v6527_v26 }
 0x102   :  { %5554 = vmatpush3.bf16.msra.mxu0 %v6512_v14  ;;  %2950 = vmatpush1.bf16.msra.mxu1 %v6525_v15 }
 0x103   :  { %5555 = vmatprep.subr.bf16.mxu0 %v6513_v17  ;;  %2951 = vmatprep.subr.bf16.mxu1 %v6530_v20 }
 0x106   :  { %5556 = vmatpush3.bf16.msra.mxu0 %v6514_v21  ;;  %2952 = vmatpush1.bf16.msra.mxu1 %v6528_v23 }
 0x107   :  { %5557 = vmatprep.subr.bf16.mxu0 %v6515_v24  ;;  %2953 = vmatprep.subr.bf16.mxu1 %v6533_v25 }
 0x10a   :  { %5558 = vmatpush3.bf16.msra.mxu0 %v6516_v27  ;;  %2954 = vmatpush1.bf16.msra.mxu1 %v6531_v28 }
 0x10b   :  { %5559 = vmatprep.subr.bf16.mxu0 %v6517_v29  ;;  %2955 = vmatprep.subr.bf16.mxu1 %v6536_v30  ;;  %v6586_v29 = vld [vmem:[%s8443_s21 + $0x180] ss:$12 sps:$4 sm:$0xff]   ;;  %v6590_v30 = vld [vmem:[%s8443_s21 + $0x188] ss:$12 sps:$4 sm:$0xff]  }
 0x10e   :  { %5560 = vmatpush3.bf16.msra.mxu0 %v6518_v31  ;;  %2956 = vmatpush1.bf16.msra.mxu1 %v6534_v32  ;;  %v6593_v32 = vld [vmem:[%s8443_s21 + $0x19c] ss:$12 sps:$4 sm:$0xff]  }
 0x10f   :  { %5561 = vmatprep.subr.bf16.mxu0 %v6519_v33  ;;  %2957 = vmatprep.subr.bf16.mxu1 %v6539_v34  ;;  %v6594_v33 = vld [vmem:[%s8443_s21 + $0x260] ss:$12 sps:$4 sm:$0xff]  }
 0x112   :  { %5562 = vmatpush3.bf16.msra.mxu0 %v6520_v35  ;;  %2958 = vmatpush1.bf16.msra.mxu1 %v6537_v36  ;;  %v6591_v35 = vld [vmem:[%s8443_s21 + $0x198] ss:$12 sps:$4 sm:$0xff]   ;;  %v6595_v36 = vld [vmem:[%s8443_s21 + $0x1a0] ss:$12 sps:$4 sm:$0xff]  }
 0x113   :  { %2959 = vmatprep.subr.bf16.mxu1 %v6542_v38  ;;  %5571 = vmatprep.subr.bf16.mxu0 %v6549_v39  ;;  %v6598_v38 = vld [vmem:[%s8443_s21 + $0x1b4] ss:$12 sps:$4 sm:$0xff]   ;;  %v6599_v39 = vld [vmem:[%s8443_s21 + $0x278] ss:$12 sps:$4 sm:$0xff]  }
 0x115   :  { %2129 = vmatmul.mubr.bf16.vlgmr.msra.gmra.mrb[8].mxu0 %v7027_v19  ;;  %v6559_v19 = vld [vmem:[%s8443_s21 + $0xf8] ss:$12 sps:$4 sm:$0xff]  }
 0x116   :  { %2960 = vmatpush1.bf16.msra.mxu1 %v6540_v40  ;;  %5572 = vmatpush3.bf16.msra.mxu0 %v6550_v41  ;;  %v6596_v40 = vld [vmem:[%s8443_s21 + $0x1b0] ss:$12 sps:$4 sm:$0xff]   ;;  %v6600_v41 = vld [vmem:[%s8443_s21 + $0x1b8] ss:$12 sps:$4 sm:$0xff]  }
 0x117   :  { %2961 = vmatprep.subr.bf16.mxu1 %v6545_v42  ;;  %5573 = vmatprep.subr.bf16.mxu0 %v6554_v44  ;;  %v6603_v42 = vld [vmem:[%s8443_s21 + $0x1cc] ss:$12 sps:$4 sm:$0xff]   ;;  %v6604_v44 = vld [vmem:[%s8443_s21 + $0x290] ss:$12 sps:$4 sm:$0xff]  }
 0x11a   :  { %2962 = vmatpush1.bf16.msra.mxu1 %v6543_v45  ;;  %5574 = vmatpush3.bf16.msra.mxu0 %v6555_v46  ;;  %v6601_v45 = vld [vmem:[%s8443_s21 + $0x1c8] ss:$12 sps:$4 sm:$0xff]   ;;  %v6605_v46 = vld [vmem:[%s8443_s21 + $0x1d0] ss:$12 sps:$4 sm:$0xff]  }
 0x11b   :  { %2963 = vmatprep.subr.bf16.mxu1 %v6548_v47  ;;  %5575 = vmatprep.subr.bf16.mxu0 %v6559_v19  ;;  %v6608_v47 = vld [vmem:[%s8443_s21 + $0x1e4] ss:$12 sps:$4 sm:$0xff]   ;;  %v6609_v19 = vld [vmem:[%s8443_s21 + $0x2a8] ss:$12 sps:$4 sm:$0xff]  }
 0x11e   :  { %2964 = vmatpush1.bf16.msra.mxu1 %v6546_v48  ;;  %5576 = vmatpush3.bf16.msra.mxu0 %v6560_v49  ;;  %v6606_v48 = vld [vmem:[%s8443_s21 + $0x1e0] ss:$12 sps:$4 sm:$0xff]   ;;  %v6610_v49 = vld [vmem:[%s8443_s21 + $0x1e8] ss:$12 sps:$4 sm:$0xff]  }
 0x11f   :  { %2965 = vmatprep.subr.bf16.mxu1 %v6553_v50  ;;  %5577 = vmatprep.subr.bf16.mxu0 %v6564_v51  ;;  %v6613_v50 = vld [vmem:[%s8443_s21 + $0x1fc] ss:$12 sps:$4 sm:$0xff]   ;;  %v6614_v51 = vld [vmem:[%s8443_s21 + $0x2c0] ss:$12 sps:$4 sm:$0xff]  }
 0x122   :  { %2966 = vmatpush1.bf16.msra.mxu1 %v6551_v60  ;;  %5578 = vmatpush3.bf16.msra.mxu0 %v6565_v22  ;;  %v6611_v60 = vld [vmem:[%s8443_s21 + $0x1f8] ss:$12 sps:$4 sm:$0xff]   ;;  %v6615_v22 = vld [vmem:[%s8443_s21 + $0x200] ss:$12 sps:$4 sm:$0xff]  }
 0x123   :  { %2967 = vmatprep.subr.bf16.mxu1 %v6558_v52  ;;  %5579 = vmatprep.subr.bf16.mxu0 %v6569_v53  ;;  %v6618_v52 = vld [vmem:[%s8443_s21 + $0x214] ss:$12 sps:$4 sm:$0xff]   ;;  %v6619_v53 = vld [vmem:[%s8443_s21 + $0x2d8] ss:$12 sps:$4 sm:$0xff]  }
 0x126   :  { %2968 = vmatpush1.bf16.msra.mxu1 %v6556_v54  ;;  %5580 = vmatpush3.bf16.msra.mxu0 %v6570_v55  ;;  %v6616_v54 = vld [vmem:[%s8443_s21 + $0x210] ss:$12 sps:$4 sm:$0xff]   ;;  %v6620_v55 = vld [vmem:[%s8443_s21 + $0x218] ss:$12 sps:$4 sm:$0xff]  }
 0x127   :  { %2969 = vmatprep.subr.bf16.mxu1 %v6563_v56  ;;  %5581 = vmatprep.subr.bf16.mxu0 %v6574_v57  ;;  %v6623_v56 = vld [vmem:[%s8443_s21 + $0x22c] ss:$12 sps:$4 sm:$0xff]   ;;  %v6624_v57 = vld [vmem:[%s8443_s21 + $0x2f0] ss:$12 sps:$4 sm:$0xff]  }
 0x12a   :  { %2970 = vmatpush1.bf16.msra.mxu1 %v6561_v58  ;;  %5582 = vmatpush3.bf16.msra.mxu0 %v6575_v59 }
 0x12b   :  { %2971 = vmatprep.subr.bf16.mxu1 %v6568_v61  ;;  %5583 = vmatprep.subr.bf16.mxu0 %v6579_v62 }
 0x12e   :  { %2972 = vmatpush1.bf16.msra.mxu1 %v6566_v63  ;;  %5584 = vmatpush3.bf16.msra.mxu0 %v6580_v0  ;;  %v6621_v0 = vld [vmem:[%s8443_s21 + $0x228] ss:$12 sps:$4 sm:$0xff]  }
 0x12f   :  { %2973 = vmatprep.subr.bf16.mxu1 %v6573_v1  ;;  %5585 = vmatprep.subr.bf16.mxu0 %v6584_v2  ;;  %v6625_v1 = vld [vmem:[%s8443_s21 + $0x230] ss:$12 sps:$4 sm:$0xff]  }
 0x132   :  { %2974 = vmatpush1.bf16.msra.mxu1 %v6571_v3  ;;  %5586 = vmatpush3.bf16.msra.mxu0 %v6585_v4 }
 0x133   :  { %2975 = vmatprep.subr.bf16.mxu1 %v6578_v5  ;;  %5593 = vmatprep.subr.bf16.mxu0 %v6589_v6  ;;  %v6628_v6 = vld [vmem:[%s8443_s21 + $0x244] ss:$12 sps:$4 sm:$0xff]  }
 0x136   :  { %2976 = vmatpush1.bf16.msra.mxu1 %v6576_v7 }
 0x137   :  { %2977 = vmatprep.subr.bf16.mxu1 %v6583_v8 }
 0x13a   :  { %2978 = vmatpush1.bf16.msra.mxu1 %v6581_v9 }
 0x13b   :  { %2988 = vmatprep.subr.bf16.mxu1 %v6588_v11 }
 0x1a8   :  { %v1845_v12 = vpop.f32.mrb[0].mxu0  ;;  %v7749_v16 = vpop.f32.mrb[0].mxu1 }
 0x1a9   :  { %vm2176_vm2 = vcmp.gt.f32.partialorder %v1845_v12, 0.0  ;;  %v2181_v13 = vmul.f32 0.2, %v1845_v12  ;;  %v1847_v18 = vpop.f32.mrb[1].mxu0  ;;  %v2011_v26 = vpop.f32.mrb[1].mxu1  ;;  %vm2178_vm5 = vcmp.gt.f32.partialorder %v7749_v16, 0.0 }
 0x1aa   :  { %vm2177_vm3 = vcmp.gt.f32.partialorder %v1847_v18, 0.0  ;;  %v2182_v14 = vmul.f32 0.2, %v1847_v18  ;;  %v1849_v15 = vpop.f32.mrb[2].mxu0  ;;  %v2013_v17 = vpop.f32.mrb[2].mxu1  ;;  %vm2179_vm4 = vcmp.gt.f32.partialorder %v2011_v26, 0.0 }
 0x1ab   :  { %v2186_v20 = vsel %vm2176_vm2, %v1845_v12, %v2181_v13  ;;  %v2184_v21 = vmul.f32 0.2, %v2011_v26  ;;  %v1850_v23 = vpop.f32.mrb[3].mxu0  ;;  %v2014_v24 = vpop.f32.mrb[3].mxu1  ;;  %v2183_v58 = vmul.f32 0.2, %v7749_v16 }
 0x1ac   :  { %v2187_v25 = vsel %vm2177_vm3, %v1847_v18, %v2182_v14  ;;  %v2191_v31 = vpack.c.bf16 %v2186_v20, %v2186_v20  ;;  %v6626_v12 = vld [vmem:[%s8443_s21 + $0x240] ss:$12 sps:$4 sm:$0xff]   ;;  %v6641_v13 = vld [vmem:[%s8443_s21 + $0x308] ss:$12 sps:$4 sm:$0xff]   ;;  %v6629_v15 = vld [vmem:[%s8443_s21 + $0x258] ss:$12 sps:$4 sm:$0xff]  }
 0x1ad   :  { %v2192_v27 = vpack.c.bf16 %v2187_v25, %v2187_v25  ;;  %v2189_v28 = vsel %vm2179_vm4, %v2011_v26, %v2184_v21  ;;  %v2188_v9 = vsel %vm2178_vm5, %v7749_v16, %v2183_v58  ;;  %v6631_v26 = vld [vmem:[%s8443_s21 + $0x25c] ss:$12 sps:$4 sm:$0xff]   ;;  %v6645_v17 = vld [vmem:[%s8443_s21 + $0x320] ss:$12 sps:$4 sm:$0xff]   ;;  %v6649_v25 = vld [vmem:[%s8443_s21 + $0x338] ss:$12 sps:$4 sm:$0xff]  }
 0x1ae   :  { %v2194_v34 = vpack.c.bf16 %v2189_v28, %v2189_v28  ;;  %v7857_v18 = vpack.c.bf16 %v2188_v9, %v2188_v9  ;;  %v6634_v21 = vld [vmem:[%s8443_s21 + $0x274] ss:$12 sps:$4 sm:$0xff]   ;;  %v6632_v24 = vld [vmem:[%s8443_s21 + $0x270] ss:$12 sps:$4 sm:$0xff]   ;;  %v3211_v9 = vld [vmem:[%s8420_s3 + $0xa8] sm:$0xff]  ;;  %vm4227_vm2 = vcmask 1043456  }
 0x1af   :  { %2979 = vmatprep.mubr.bf16.mxu1 %v2192_v27  ;;  %3102 = vmatprep.mubr.bf16.mxu0 %v2192_v27  ;;  %v6637_v27 = vld [vmem:[%s8443_s21 + $0x28c] ss:$12 sps:$4 sm:$0xff]   ;;  %v6635_v28 = vld [vmem:[%s8443_s21 + $0x288] ss:$12 sps:$4 sm:$0xff]   ;;  %vm6713_vm3 = vmmov 1   ;;  %vm4207_vm5 = vcmask 877568  }
 0x1b0   :  { %2980 = vmatmul.mubr.bf16.vlgmr.msra.gmra.mrb[12].mxu1 %v2191_v31  ;;  %3103 = vmatmul.mubr.bf16.vlgmr.msra.gmra.mrb[12].mxu0 %v2191_v31  ;;  %v6657_v31 = vld [vmem:[%s8443_s21 + $0x368] ss:$12 sps:$4 sm:$0x3f]   ;;  %vm8278_vm4 = vmpackc.low %vm4227_vm2, %vm6713_vm3 }
 0x1b1   :  { %2989 = vmatpush1.bf16.msra.mxu1 %v6586_v29  ;;  %5594 = vmatpush3.bf16.msra.mxu0 %v6590_v30  ;;  %v6653_v29 = vld [vmem:[%s8443_s21 + $0x350] ss:$12 sps:$4 sm:$0xff]  }
 0x1b2   :  { %3020 = vmatprep.mubr.bf16.mxu1 %v2194_v34  ;;  %3142 = vmatprep.mubr.bf16.mxu0 %v2194_v34  ;;  %v6640_v30 = vld [vmem:[%s8443_s21 + $0x2a4] ss:$12 sps:$4 sm:$0xff]   ;;  %v2945_v34 = vsel %vm2937_vm6, %v6657_v31, 0 }
 0x1b3   :  { %2990 = vmatprep.subr.bf16.mxu1 %v6593_v32  ;;  %5595 = vmatprep.subr.bf16.mxu0 %v6594_v33  ;;  %v6638_v32 = vld [vmem:[%s8443_s21 + $0x2a0] ss:$12 sps:$4 sm:$0xff]   ;;  %v6644_v33 = vld [vmem:[%s8443_s21 + $0x2bc] ss:$12 sps:$4 sm:$0xff]  }
 0x1b5   :  { %2991 = vmatpush1.bf16.msra.mxu1 %v6591_v35  ;;  %5596 = vmatpush3.bf16.msra.mxu0 %v6595_v36  ;;  %v6642_v35 = vld [vmem:[%s8443_s21 + $0x2b8] ss:$12 sps:$4 sm:$0xff]   ;;  %v6648_v36 = vld [vmem:[%s8443_s21 + $0x2d4] ss:$12 sps:$4 sm:$0xff]  }
 0x1b6   :  { %2992 = vmatprep.subr.bf16.mxu1 %v6598_v38  ;;  %5597 = vmatprep.subr.bf16.mxu0 %v6599_v39  ;;  %v6646_v38 = vld [vmem:[%s8443_s21 + $0x2d0] ss:$12 sps:$4 sm:$0xff]   ;;  %v6652_v39 = vld [vmem:[%s8443_s21 + $0x2ec] ss:$12 sps:$4 sm:$0xff]  }
 0x1b9   :  { %2993 = vmatpush1.bf16.msra.mxu1 %v6596_v40  ;;  %5598 = vmatpush3.bf16.msra.mxu0 %v6600_v41 }
 0x1ba   :  { %2994 = vmatprep.subr.bf16.mxu1 %v6603_v42  ;;  %5599 = vmatprep.subr.bf16.mxu0 %v6604_v44  ;;  %v6650_v44 = vld [vmem:[%s8443_s21 + $0x2e8] ss:$12 sps:$4 sm:$0xff]  }
 0x1bd   :  { %2995 = vmatpush1.bf16.msra.mxu1 %v6601_v45  ;;  %5600 = vmatpush3.bf16.msra.mxu0 %v6605_v46  ;;  %v6656_v46 = vld [vmem:[%s8443_s21 + $0x304] ss:$12 sps:$4 sm:$0xff]  }
 0x1be   :  { %2996 = vmatprep.subr.bf16.mxu1 %v6608_v47  ;;  %5601 = vmatprep.subr.bf16.mxu0 %v6609_v19 }
 0x1c1   :  { %2997 = vmatpush1.bf16.msra.mxu1 %v6606_v48  ;;  %5602 = vmatpush3.bf16.msra.mxu0 %v6610_v49  ;;  %v6654_v49 = vld [vmem:[%s8443_s21 + $0x300] ss:$12 sps:$4 sm:$0xff]  }
 0x1c2   :  { %2998 = vmatprep.subr.bf16.mxu1 %v6613_v50  ;;  %5603 = vmatprep.subr.bf16.mxu0 %v6614_v51  ;;  %v6660_v50 = vld [vmem:[%s8443_s21 + $0x31c] ss:$12 sps:$4 sm:$0xff]  }
 0x1c5   :  { %2999 = vmatpush1.bf16.msra.mxu1 %v6611_v60  ;;  %5604 = vmatpush3.bf16.msra.mxu0 %v6615_v22  ;;  %v6658_v22 = vld [vmem:[%s8443_s21 + $0x318] ss:$12 sps:$4 sm:$0xff]  }
 0x1c6   :  { %3000 = vmatprep.subr.bf16.mxu1 %v6618_v52  ;;  %5605 = vmatprep.subr.bf16.mxu0 %v6619_v53  ;;  %v6663_v53 = vld [vmem:[%s8443_s21 + $0x334] ss:$12 sps:$4 sm:$0xff]  }
 0x1c8   :  { %v5519_v59 = vpop.f32.mrb[4].mxu0  ;;  %v5541_v61 = vpop.f32.mrb[4].mxu1 }
 0x1c9   :  { %v5520_v62 = vpop.f32.mrb[5].mxu0  ;;  %v5542_v63 = vpop.f32.mrb[5].mxu1  ;;  %3001 = vmatpush1.bf16.msra.mxu1 %v6616_v54  ;;  %5606 = vmatpush3.bf16.msra.mxu0 %v6620_v55  ;;  %v6661_v54 = vld [vmem:[%s8443_s21 + $0x330] ss:$12 sps:$4 sm:$0xff]   ;;  %v6666_v55 = vld [vmem:[%s8443_s21 + $0x34c] ss:$12 sps:$4 sm:$0xff]  }
 0x1ca   :  { %v5521_v2 = vadd.f32 %v5520_v62, %v5519_v59  ;;  %v5522_v3 = vpop.f32.mrb[6].mxu0  ;;  %v5543_v4 = vadd.f32 %v5542_v63, %v5541_v61  ;;  %v5544_v5 = vpop.f32.mrb[6].mxu1  ;;  %3002 = vmatprep.subr.bf16.mxu1 %v6623_v56  ;;  %5607 = vmatprep.subr.bf16.mxu0 %v6624_v57  ;;  %v6667_v56 = vld [vmem:[%s8443_s21 + $0x364] ss:$12 sps:$4 sm:$0x3f]   ;;  %v3207_v61 = vld [vmem:[%s8420_s3 + $0x88] sm:$0xff] }
 0x1cb   :  { %v5523_v7 = vpop.f32.mrb[7].mxu0  ;;  %v5545_v8 = vpop.f32.mrb[7].mxu1  ;;  %v6669_v57 = vld [vmem:[%s8443_s21 + $0x360] ss:$12 sps:$4 sm:$0x3f]   ;;  %v3209_v3 = vld [vmem:[%s8420_s3 + $0x98] sm:$0xff] }
 0x1cc   :  { %v7849_v11 = vadd.f32 %v5543_v4, %v5521_v2  ;;  %v2939_v58 = vsel %vm2937_vm6, %v6669_v57, 0  ;;  %v3206_v59 = vld [vmem:[%s8420_s3 + $0x80] sm:$0xff]  ;;  %v3208_v2 = vld [vmem:[%s8420_s3 + $0x90] sm:$0xff] }
 0x1cd   :  { %3003 = vmatpush1.bf16.msra.mxu1 %v6621_v0  ;;  %5608 = vmatpush3.bf16.msra.mxu0 %v6625_v1  ;;  %v3190_v62 = vld [vmem:[%s8420_s3] sm:$0xff]  ;;  %v6000_v63 = vpack.c.bf16 %v3207_v61, %v3206_v59  ;;  %v3191_v0 = vld [vmem:[%s8420_s3 + $0x8] sm:$0xff]  ;;  %v6004_v4 = vpack.c.bf16 %v3209_v3, %v3208_v2  ;;  %v3192_v5 = vld [vmem:[%s8420_s3 + $0x10] sm:$0xff] }
 0x1ce   :  { %3004 = vmatprep.subr.bf16.mxu1 %v6628_v6  ;;  %5802 = vmatprep.subr.bf16.mxu0 %v6710_v10  ;;  %v6002_v1 = vpack.c.bf16 %v3191_v0, %v3190_v62  ;;  %v3193_v6 = vld [vmem:[%s8420_s3 + $0x18] sm:$0xff]  ;;  %v3210_v8 = vld [vmem:[%s8420_s3 + $0xa0] sm:$0xff] }
 0x1cf   :  { %v6006_v7 = vpack.c.bf16 %v3193_v6, %v3192_v5 }
 0x1d0   :  { %v2170_v16 = vpop.f32.mrb[8].mxu1  ;;  %3143 = vmatmul.mubr.bf16.vlgmr.msra.gmra.mrb[16].mxu0 %v7857_v18 }
 0x1d1   :  { %v5800_v14 = vpop.f32.mrb[9].mxu1  ;;  %3005 = vmatpush1.bf16.msra.mxu1 %v6626_v12  ;;  %5803 = vmatpush3.bf16.msra.mxu0 %v6641_v13  ;;  %v3194_v12 = vld [vmem:[%s8420_s3 + $0x20] sm:$0xff]  ;;  %v3195_v13 = vld [vmem:[%s8420_s3 + $0x28] sm:$0xff] }
 0x1d2   :  { %v2173_v20 = vpop.f32.mrb[10].mxu1  ;;  %3006 = vmatprep.subr.bf16.mxu1 %v6631_v26  ;;  %5804 = vmatprep.subr.bf16.mxu0 %v6710_v10  ;;  %v3212_v26 = vld [vmem:[%s8420_s3 + $0xb0] sm:$0xff] }
 0x1d3   :  { %v5801_v23 = vpop.f32.mrb[11].mxu1  ;;  %5812 = vmatprep.mubr.msk.bf16.mxu0 %vm6711_vm1, %v6710_v10 }
 0x1d4   :  { %v3215_v23 = vld [vmem:[%s8420_s3 + $0xc8] sm:$0xff] }
 0x1d5   :  { %3007 = vmatpush1.bf16.msra.mxu1 %v6629_v15  ;;  %5805 = vmatpush3.bf16.msra.mxu0 %v6645_v17  ;;  %v3196_v15 = vld [vmem:[%s8420_s3 + $0x30] sm:$0xff]  ;;  %v3197_v17 = vld [vmem:[%s8420_s3 + $0x38] sm:$0xff] }
 0x1d6   :  { %3008 = vmatprep.subr.bf16.mxu1 %v6634_v21  ;;  %5806 = vmatprep.subr.bf16.mxu0 %v6710_v10  ;;  %v6014_v20 = vpack.c.bf16 %v3197_v17, %v3196_v15  ;;  %v3214_v21 = vld [vmem:[%s8420_s3 + $0xc0] sm:$0xff] }
 0x1d9   :  { %3009 = vmatpush1.bf16.msra.mxu1 %v6632_v24  ;;  %5807 = vmatpush3.bf16.msra.mxu0 %v6649_v25  ;;  %v6016_v24 = vpack.c.bf16 %v3215_v23, %v3214_v21  ;;  %v3198_v25 = vld [vmem:[%s8420_s3 + $0x40] sm:$0xff] }
 0x1da   :  { %3010 = vmatprep.subr.bf16.mxu1 %v6637_v27  ;;  %5808 = vmatprep.subr.bf16.mxu0 %v6710_v10  ;;  %v3199_v27 = vld [vmem:[%s8420_s3 + $0x48] sm:$0xff] }
 0x1dd   :  { %3011 = vmatpush1.bf16.msra.mxu1 %v6635_v28  ;;  %5809 = vmatpush3.bf16.msra.mxu0 %v6653_v29  ;;  %v6018_v28 = vpack.c.bf16 %v3199_v27, %v3198_v25  ;;  %v3216_v29 = vld [vmem:[%s8420_s3 + $0xd0] sm:$0xff] }
 0x1de   :  { %3012 = vmatprep.subr.bf16.mxu1 %v6640_v30  ;;  %5810 = vmatprep.subr.bf16.mxu0 %v6710_v10  ;;  %v3217_v30 = vld [vmem:[%s8420_s3 + $0xd8] sm:$0xff] }
 0x1df   :  { %v6020_v31 = vpack.c.bf16 %v3217_v30, %v3216_v29 }
 0x1e1   :  { %3013 = vmatpush1.bf16.msra.mxu1 %v6638_v32  ;;  %5811 = vmatpush3.bf16.msra.mxu0 %v2945_v34  ;;  %v3200_v32 = vld [vmem:[%s8420_s3 + $0x50] sm:$0xff] }
 0x1e2   :  { %3014 = vmatprep.subr.bf16.mxu1 %v6644_v33  ;;  %6001 = vmatprep.subr.bf16.mxu0 %v6000_v63  ;;  %v3201_v33 = vld [vmem:[%s8420_s3 + $0x58] sm:$0xff] }
 0x1e3   :  { %v6022_v34 = vpack.c.bf16 %v3201_v33, %v3200_v32  ;;  %v3222_v32 = vld [vmem:[%s8420_s3 + $0x100] sm:$0xff]  ;;  %v3223_v33 = vld [vmem:[%s8420_s3 + $0x108] sm:$0xff] }
 0x1e5   :  { %3015 = vmatpush1.bf16.msra.mxu1 %v6642_v35  ;;  %v3218_v35 = vld [vmem:[%s8420_s3 + $0xe0] sm:$0xff] }
 0x1e6   :  { %3016 = vmatprep.subr.bf16.mxu1 %v6648_v36  ;;  %v3219_v36 = vld [vmem:[%s8420_s3 + $0xe8] sm:$0xff] }
 0x1e8   :  { %v5563_v40 = vpop.f32.mrb[8].mxu0 }
 0x1e9   :  { %v5564_v41 = vpop.f32.mrb[9].mxu0  ;;  %3017 = vmatpush1.bf16.msra.mxu1 %v6646_v38  ;;  %v6024_v38 = vpack.c.bf16 %v3219_v36, %v3218_v35 }
 0x1ea   :  { %v5565_v42 = vadd.f32 %v5564_v41, %v5563_v40  ;;  %v5566_v45 = vpop.f32.mrb[10].mxu0  ;;  %3018 = vmatprep.subr.bf16.mxu1 %v6652_v39  ;;  %v3202_v39 = vld [vmem:[%s8420_s3 + $0x60] sm:$0xff]  ;;  %v3203_v40 = vld [vmem:[%s8420_s3 + $0x68] sm:$0xff] }
 0x1eb   :  { %v5567_v47 = vpop.f32.mrb[11].mxu0  ;;  %v6026_v41 = vpack.c.bf16 %v3203_v40, %v3202_v39 }
 0x1ec   :  { %v2131_v19 = vadd.f32 %v5565_v42, %v7849_v11  ;;  %v6008_v11 = vpack.c.bf16 %v3211_v9, %v3210_v8  ;;  %v3220_v42 = vld [vmem:[%s8420_s3 + $0xf0] sm:$0xff]  ;;  %v3205_v47 = vld [vmem:[%s8420_s3 + $0x78] sm:$0xff] }
 0x1ed   :  { %3019 = vmatpush1.bf16.msra.mxu1 %v6650_v44  ;;  %v3221_v44 = vld [vmem:[%s8420_s3 + $0xf8] sm:$0xff] }
 0x1ee   :  { %v2171_v48 = vadd.f32 %v2170_v16, %v2131_v19  ;;  %3029 = vmatprep.subr.bf16.mxu1 %v6656_v46  ;;  %v3213_v16 = vld [vmem:[%s8420_s3 + $0xb8] sm:$0xff]  ;;  %v6028_v45 = vpack.c.bf16 %v3221_v44, %v3220_v42  ;;  %v3204_v46 = vld [vmem:[%s8420_s3 + $0x70] sm:$0xff] }
 0x1ef   :  { %v6012_v14 = vpack.c.bf16 %v3213_v16, %v3212_v26  ;;  %v6030_v19 = vpack.c.bf16 %v3205_v47, %v3204_v46  ;;  %v3224_v46 = vld [vmem:[%s8420_s3 + $0x110] sm:$0xff]  ;;  %v3225_v47 = vld [vmem:[%s8420_s3 + $0x118] sm:$0xff] }
 0x1f0   :  { %vm2180_vm7 = vcmp.gt.f32.partialorder %v2171_v48, 0.0  ;;  %v2185_v51 = vmul.f32 0.2, %v2171_v48  ;;  %3021 = vmatmul.mubr.bf16.vlgmr.msra.gmra.mrb[12].mxu1 %v7857_v18  ;;  %v6010_v18 = vpack.c.bf16 %v3195_v13, %v3194_v12 }
 0x1f1   :  { %3030 = vmatpush1.bf16.msra.mxu1 %v6654_v49  ;;  %3061 = vmatprep.mubr.bf16.mxu1 %v6709_v37  ;;  %v6664_v37 = vld [vmem:[%s8443_s21 + $0x348] ss:$12 sps:$4 sm:$0xff]  }
 0x1f2   :  { %v2190_v60 = vsel %vm2180_vm7, %v2171_v48, %v2185_v51  ;;  %3031 = vmatprep.subr.bf16.mxu1 %v6660_v50  ;;  %v6712_v48 = vmov 0.0|0.0   ;;  %vm4223_vm7 = vcmask 883712  }
 0x1f3   :  { %v2195_v52 = vpack.c.bf16 %v2190_v60, %v2190_v60 }
 0x1f5   :  { %5813 = vmatmul.mubr.msk.bf16.vlgmr.msra.gmra.mrb[20].mxu0 %vm2933_vm8, %v2195_v52  ;;  %3032 = vmatpush1.bf16.msra.mxu1 %v6658_v22 }
 0x1f6   :  { %3033 = vmatprep.subr.bf16.mxu1 %v6663_v53  ;;  %6003 = vmatpush3.bf16.msra.mxu0 %v6002_v1 }
 0x1f7   :  { %6005 = vmatprep.subr.bf16.mxu0 %v6004_v4 }
 0x1f9   :  { %3034 = vmatpush1.bf16.msra.mxu1 %v6661_v54 }
 0x1fa   :  { %3035 = vmatprep.subr.bf16.mxu1 %v6666_v55  ;;  %6007 = vmatpush3.bf16.msra.mxu0 %v6006_v7 }
 0x1fb   :  { %6009 = vmatprep.subr.bf16.mxu0 %v6008_v11 }
 0x1fd   :  { %3036 = vmatpush1.bf16.msra.mxu1 %v6664_v37 }
 0x1fe   :  { %5439 = vmatprep.subr.msk.bf16.mxu1 %vm2937_vm6, %v6667_v56  ;;  %6011 = vmatpush3.bf16.msra.mxu0 %v6010_v18 }
 0x1ff   :  { %6013 = vmatprep.subr.bf16.mxu0 %v6012_v14 }
 0x201   :  { %3038 = vmatpush1.bf16.msra.mxu1 %v2939_v58 }
 0x202   :  { %6039 = vmatprep.subr.bf16.mxu1 %v6000_v63  ;;  %6015 = vmatpush3.bf16.msra.mxu0 %v6014_v20 }
 0x203   :  { %6017 = vmatprep.subr.bf16.mxu0 %v6016_v24 }
 0x204   :  { %5440 = vmatmul.mubr.msk.bf16.vlgmr.msra.gmra.mrb[12].mxu1 %vm2933_vm8, %v2195_v52  ;;  %vm4381_vm8 = vcmask 97280  }
 0x205   :  { %6041 = vmatpush3.bf16.msra.mxu1 %v6002_v1 }
 0x206   :  { %6043 = vmatprep.subr.bf16.mxu1 %v6004_v4  ;;  %6019 = vmatpush3.bf16.msra.mxu0 %v6018_v28 }
 0x207   :  { %6021 = vmatprep.subr.bf16.mxu0 %v6020_v31 }
 0x209   :  { %6045 = vmatpush3.bf16.msra.mxu1 %v6006_v7 }
 0x20a   :  { %6047 = vmatprep.subr.bf16.mxu1 %v6008_v11  ;;  %6023 = vmatpush3.bf16.msra.mxu0 %v6022_v34 }
 0x20b   :  { %6025 = vmatprep.subr.bf16.mxu0 %v6024_v38 }
 0x20d   :  { %6049 = vmatpush3.bf16.msra.mxu1 %v6010_v18 }
 0x20e   :  { %6051 = vmatprep.subr.bf16.mxu1 %v6012_v14  ;;  %6027 = vmatpush3.bf16.msra.mxu0 %v6026_v41 }
 0x20f   :  { %6029 = vmatprep.subr.bf16.mxu0 %v6028_v45 }
 0x211   :  { %6053 = vmatpush3.bf16.msra.mxu1 %v6014_v20 }
 0x212   :  { %6055 = vmatprep.subr.bf16.mxu1 %v6016_v24  ;;  %6031 = vmatpush3.bf16.msra.mxu0 %v6030_v19 }
 0x213   :  { %6032 = vmatprep.subr.bf16.mxu0 %v6712_v48 }
 0x215   :  { %6057 = vmatpush3.bf16.msra.mxu1 %v6018_v28 }
 0x216   :  { %6059 = vmatprep.subr.bf16.mxu1 %v6020_v31 }
 0x219   :  { %6061 = vmatpush3.bf16.msra.mxu1 %v6022_v34 }
 0x21a   :  { %6063 = vmatprep.subr.bf16.mxu1 %v6024_v38 }
 0x21d   :  { %6065 = vmatpush3.bf16.msra.mxu1 %v6026_v41  ;;  %v6033_v41 = vpack.c.bf16 %v3223_v33, %v3222_v32  ;;  %v6680_v32 = vld [vmem:[%s8422_s7 + $0x68] sm:$0xff]  }
 0x21e   :  { %6067 = vmatprep.subr.bf16.mxu1 %v6028_v45  ;;  %v6681_v33 = vld [vmem:[%s8422_s7 + $0x28] sm:$0xff]  }
 0x221   :  { %6069 = vmatpush3.bf16.msra.mxu1 %v6030_v19 }
 0x222   :  { %5852 = vmatprep.subr.bf16.mxu1 %v6710_v10 }
 0x283   :  { %v5587_v49 = vpop.f32.mrb[12].mxu0 }
 0x284   :  { %v5588_v50 = vpop.f32.mrb[13].mxu0 }
 0x285   :  { %v5589_v51 = vadd.f32 %v5588_v50, %v5587_v49  ;;  %v5590_v60 = vpop.f32.mrb[14].mxu0 }
 0x286   :  { %v5591_v22 = vpop.f32.mrb[15].mxu0 }
 0x2a3   :  { %v5609_v52 = vpop.f32.mrb[16].mxu0 }
 0x2a4   :  { %v5610_v53 = vpop.f32.mrb[17].mxu0 }
 0x2a5   :  { %v5611_v54 = vadd.f32 %v5610_v53, %v5609_v52  ;;  %v5612_v55 = vpop.f32.mrb[18].mxu0  ;;  %v3226_v53 = vld [vmem:[%s8420_s3 + $0x120] sm:$0x3f] }
 0x2a6   :  { %v5613_v37 = vpop.f32.mrb[19].mxu0 }
 0x2a7   :  { %v3145_v56 = vadd.f32 %v5611_v54, %v5589_v51  ;;  %v6036_v51 = vpack.c.bf16 %v3225_v47, %v3224_v46 }
 0x2c8   :  { %v3184_v57 = vpop.f32.mrb[20].mxu0 }
 0x2c9   :  { %v8057_v58 = vadd.f32 %v3184_v57, %v3145_v56  ;;  %v5814_v59 = vpop.f32.mrb[21].mxu0  ;;  %v3228_v57 = vld [vmem:[%s8421_s4 + $0x8] sm:$0x3f] }
 0x2ca   :  { %v3187_v61 = vpop.f32.mrb[22].mxu0  ;;  %v3227_v59 = vld [vmem:[%s8421_s4] sm:$0x3f] }
 0x2cb   :  { %v5815_v62 = vpop.f32.mrb[23].mxu0  ;;  %v3248_v0 = vsel %vm3247_vm9, %v8057_v58, 0.0  ;;  %v3257_v20 = vmul.f32 %v8057_v58, %v8057_v58 }
 0x2cc   :  { %v3249_v12 = vrot.slane %v3248_v0, 4 }
 0x2cd   :  { %v3272_v34 = vsel %vm3247_vm9, %v3257_v20, 0.0  ;;  %v6670_v20 = vld [vmem:[%s8422_s7 + $0x40] sm:$0xff]   ;;  %vm4668_vm9 = vcmask 189440  }
 0x2ce   :  { %v3250_v24 = vadd.f32 %v3249_v12, %v3248_v0  ;;  %v3273_v44 = vrot.slane %v3272_v34, 4 }
 0x2d0   :  { %v3251_v38 = vrot.slane %v3250_v24, 2  ;;  %v3274_v60 = vadd.f32 %v3273_v44, %v3272_v34  ;;  %v6682_v34 = vld [vmem:[%s8422_s7 + $0x80] sm:$0xff]   ;;  %v8197_v44 = vsub.s32 0, %v6926_v43 }
 0x2d2   :  { %v3252_v49 = vadd.f32 %v3251_v38, %v3250_v24  ;;  %v3275_v52 = vrot.slane %v3274_v60, 2  ;;  %v6673_v24 = vld [vmem:[%s8422_s7 + $0x8] sm:$0xff]  }
 0x2d3   :  { %v6685_v38 = vld [vmem:[%s8422_s7 + $0x88] sm:$0xff]  }
 0x2d4   :  { %v3253_v22 = vrot.slane %v3252_v49, 1  ;;  %v3276_v55 = vadd.f32 %v3275_v52, %v3274_v60  ;;  %v3911_v52 = vsub.s32 1, %v6926_v43 }
 0x2d6   :  { %v3254_v54 = vadd.f32 %v3253_v22, %v3252_v49  ;;  %v3277_v37 = vrot.slane %v3276_v55, 1  ;;  %v3230_v22 = vld [vmem:[%s8423_s5] sm:$0x7] }
 0x2d7   :  { %v8059_v63 = vpop.f32.mrb[12].mxu1 }
 0x2d8   :  { %v3233_v1 = vsel %vm3232_vm10, %v8059_v63, 0.0  ;;  %v3255_v2 = vmul.f32 %v8059_v63, %v8059_v63  ;;  %v8067_v3 = vpop.f32.mrb[13].mxu1  ;;  %v3278_v56 = vadd.f32 %v3277_v37, %v3276_v55 }
 0x2d9   :  { %v3234_v4 = vrot.slane %v3233_v1, 4  ;;  %v3240_v5 = vsel %vm3232_vm10, %v8067_v3, 0.0  ;;  %v3256_v6 = vmul.f32 %v8067_v3, %v8067_v3  ;;  %v3067_v7 = vpop.f32.mrb[14].mxu1 }
 0x2da   :  { %v3258_v8 = vsel %vm3232_vm10, %v3255_v2, 0.0  ;;  %v3241_v9 = vrot.slane %v3240_v5, 4  ;;  %v3068_v11 = vpop.f32.mrb[15].mxu1 }
 0x2db   :  { %v3235_v13 = vadd.f32 %v3234_v4, %v3233_v1  ;;  %v3259_v18 = vrot.slane %v3258_v8, 4  ;;  %v3265_v26 = vsel %vm3232_vm10, %v3256_v6, 0.0  ;;  %vm4684_vm10 = vcmask 195584  }
 0x2dc   :  { %v3242_v16 = vadd.f32 %v3241_v9, %v3240_v5  ;;  %v3266_v14 = vrot.slane %v3265_v26, 4  ;;  %v3229_v9 = vld [vmem:[%s8421_s4 + $0x10] sm:$0x3f] }
 0x2dd   :  { %v3236_v15 = vrot.slane %v3235_v13, 2  ;;  %v3260_v17 = vadd.f32 %v3259_v18, %v3258_v8 }
 0x2de   :  { %v3243_v21 = vrot.slane %v3242_v16, 2  ;;  %v3267_v23 = vadd.f32 %v3266_v14, %v3265_v26 }
 0x2df   :  { %v3237_v25 = vadd.f32 %v3236_v15, %v3235_v13  ;;  %v3261_v27 = vrot.slane %v3260_v17, 2 }
 0x2e0   :  { %v3244_v28 = vadd.f32 %v3243_v21, %v3242_v16  ;;  %v3268_v29 = vrot.slane %v3267_v23, 2  ;;  %v6671_v21 = vld [vmem:[%s8422_s7] sm:$0xff]  }
 0x2e1   :  { %v3238_v30 = vrot.slane %v3237_v25, 1  ;;  %v3262_v31 = vadd.f32 %v3261_v27, %v3260_v17  ;;  %v6675_v27 = vld [vmem:[%s8422_s7 + $0x10] sm:$0xff]  }
 0x2e2   :  { %v3245_v35 = vrot.slane %v3244_v28, 1  ;;  %v3269_v36 = vadd.f32 %v3268_v29, %v3267_v23  ;;  %v6672_v23 = vld [vmem:[%s8422_s7 + $0x48] sm:$0xff]   ;;  %v6677_v29 = vld [vmem:[%s8422_s7 + $0x18] sm:$0xff]  }
 0x2e3   :  { %v3263_v39 = vrot.slane %v3262_v31, 1  ;;  %v3239_v45 = vadd.f32 %v3238_v30, %v3237_v25  ;;  %v6674_v25 = vld [vmem:[%s8422_s7 + $0x50] sm:$0xff]   ;;  %v6678_v30 = vld [vmem:[%s8422_s7 + $0x60] sm:$0xff]  }
 0x2e4   :  { %v3246_v40 = vadd.f32 %v3245_v35, %v3244_v28  ;;  %v3270_v42 = vrot.slane %v3269_v36, 1  ;;  %v6676_v28 = vld [vmem:[%s8422_s7 + $0x58] sm:$0xff]   ;;  %v6683_v35 = vld [vmem:[%s8422_s7 + $0x70] sm:$0xff]  }
 0x2e5   :  { %v3264_v50 = vadd.f32 %v3263_v39, %v3262_v31  ;;  %v6679_v31 = vld [vmem:[%s8422_s7 + $0x20] sm:$0xff]   ;;  %v6686_v39 = vld [vmem:[%s8422_s7 + $0x78] sm:$0xff]  }
 0x2e6   :  { %3350 = vmatprep.mubr.f32.mxu0 %v3246_v40  ;;  %v3271_v19 = vadd.f32 %v3270_v42, %v3269_v36  ;;  %v6684_v36 = vld [vmem:[%s8422_s7 + $0x30] sm:$0xff]   ;;  %v6687_v40 = vld [vmem:[%s8422_s7 + $0x38] sm:$0xff]  }
 0x2e7   :  { %3351 = vmatmul.mubr.f32.vlgmr.msra.gmra.mrb[24].mxu0 %v3239_v45 }
 0x2e8   :  { %6034 = vmatpush3.bf16.msra.mxu0 %v6033_v41  ;;  %3494 = vmatprep.mubr.f32.mxu1 %v3271_v19 }
 0x2e9   :  { %3495 = vmatmul.mubr.f32.vlgmr.msra.gmra.mrb[16].mxu1 %v3264_v50  ;;  %6035 = vmatprep.subr.bf16.mxu0 %v6712_v48 }
 0x2ea   :  { %5826 = vmatprep.mubr.msk.f32.mxu0 %vm6711_vm1, %v6710_v10  ;;  %5858 = vmatprep.mubr.msk.bf16.mxu1 %vm6711_vm1, %v6710_v10 }
 0x2eb   :  { %5853 = vmatpush3.bf16.msra.mxu1 %v6682_v34 }
 0x2ec   :  { %6037 = vmatpush3.bf16.msra.mxu0 %v6036_v51  ;;  %5854 = vmatprep.subr.bf16.mxu1 %v6710_v10 }
 0x2ed   :  { %5824 = vmatprep.subr.mxu0 %v6710_v10 }
 0x2ef   :  { %5855 = vmatpush3.bf16.msra.mxu1 %v6685_v38 }
 0x2f0   :  { %5825 = vmatpush3.msk.msra.mxu0 %vm2937_vm6, %v3226_v53  ;;  %5856 = vmatprep.subr.bf16.mxu1 %v6710_v10 }
 0x2f1   :  { %5827 = vmatmul.mubr.msk.f32.vlgmr.msra.gmra.mrb[26].mxu0 %vm3279_vm11, %v3254_v54  ;;  %6070 = vmatprep.subr.bf16.mxu0 %v6712_v48 }
 0x2f2   :  { %6072 = vmatpush3.bf16.msra.mxu0 %v6033_v41  ;;  %5839 = vmatprep.mubr.msk.f32.mxu0 %vm6711_vm1, %v6710_v10  ;;  %v6688_v41 = vld [vmem:[%s8422_s7 + $0x90] ss:$0 sps:$4 sm:$0x77]  }
 0x2f3   :  { %6073 = vmatprep.subr.bf16.mxu0 %v6712_v48  ;;  %v4107_v42 = vsel %vm4105_vm13, %v6688_v41, 0 }
 0x2f4   :  { %5857 = vmatpush3.bf16.msra.mxu1 %v4107_v42  ;;  %v4199_v42 = vld [vmem:[%s8425_s8 + $0x50] sm:$0xff] }
 0x2f5   :  { %6076 = vmatprep.subr.bf16.mxu1 %v6712_v48 }
 0x2f6   :  { %6075 = vmatpush3.bf16.msra.mxu0 %v6036_v51 }
 0x2f7   :  { %5837 = vmatprep.subr.mxu0 %v6710_v10 }
 0x2fa   :  { %5838 = vmatpush3.msk.msra.mxu0 %vm2937_vm6, %v3226_v53  ;;  %v3231_v53 = vld [vmem:[%s8424_s6] sm:$0x7] }
 0x2fb   :  { %5840 = vmatmul.mubr.msk.f32.vlgmr.msra.gmra.mrb[28].mxu0 %vm3279_vm11, %v3278_v56  ;;  %5446 = vmatprep.subr.msk.mxu0 %vm2937_vm6, %v3228_v57  ;;  %v3915_v56 = vsub.s32 2, %v6926_v43 }
 0x2fc   :  { %3653 = vmatprep.mubr.f32.mxu0 %v6710_v10  ;;  %5447 = vmatpush1.msk.msra.mxu0 %vm2937_vm6, %v3227_v59 }
 0x2fd   :  { %5842 = vmatprep.subr.mxu0 %v6710_v10  ;;  %v3935_v43 = vrot.slane %v3231_v53, %v3915_v56 }
 0x3ba   :  { %v5653_v61 = vpop.f32.mrb[24].mxu0 }
 0x3bb   :  { %v5654_v62 = vpop.f32.mrb[25].mxu0 }
 0x3bc   :  { %v5655_v0 = vadd.f32 %v5654_v62, %v5653_v61  ;;  %v5694_v1 = vpop.f32.mrb[16].mxu1  ;;  %v3927_v62 = vrot.slane %v3231_v53, %v8197_v44 }
 0x3bd   :  { %v5695_v2 = vpop.f32.mrb[17].mxu1 }
 0x3be   :  { %v5696_v4 = vadd.f32 %v5695_v2, %v5694_v1  ;;  %v3931_v1 = vrot.slane %v3231_v53, %v3911_v52 }
 0x3c4   :  { %v3422_v5 = vpop.f32.mrb[26].mxu0 }
 0x3c5   :  { %v3423_v6 = vadd.f32 %v5655_v0, %v3422_v5  ;;  %v5828_v7 = vpop.f32.mrb[27].mxu0 }
 0x3c6   :  { %v3916_v7 = vrot.slane %v3230_v22, %v3915_v56 }
 0x3c7   :  { %v3426_v8 = vmul.f32 0.010204081, %v3423_v6 }
 0x3c9   :  { %5448 = vmatmul.mubr.msk.f32.vlgmr.msra.gmra.mrb[30].mxu0 %vm3576_vm12, %v3426_v8  ;;  %v3571_v26 = vmul.f32 %v3426_v8, %v3426_v8 }
 0x3ca   :  { %5843 = vmatpush3.msk.msra.mxu0 %vm2937_vm6, %v3229_v9  ;;  %5844 = vmatprep.mubr.msk.f32.mxu0 %vm6711_vm1, %v6710_v10 }
 0x3cb   :  { %5451 = vmatprep.subr.msk.mxu0 %vm2937_vm6, %v3228_v57 }
 0x3cd   :  { %5845 = vmatmul.mubr.msk.f32.vlgmr.msra.gmra.mrb[32].mxu0 %vm3576_vm12, %v3426_v8 }
 0x3ce   :  { %v3566_v11 = vpop.f32.mrb[28].mxu0  ;;  %5452 = vmatpush1.msk.msra.mxu0 %vm2937_vm6, %v3227_v59  ;;  %3797 = vmatprep.mubr.f32.mxu0 %v6710_v10  ;;  %v3912_v59 = vrot.slane %v3230_v22, %v3911_v52 }
 0x3cf   :  { %v3567_v12 = vadd.f32 %v5696_v4, %v3566_v11  ;;  %v5841_v13 = vpop.f32.mrb[29].mxu0  ;;  %5847 = vmatprep.subr.mxu0 %v6710_v10 }
 0x3d1   :  { %v3570_v18 = vmul.f32 0.010204081, %v3567_v12 }
 0x3d3   :  { %v3572_v16 = vsub.f32 %v3570_v18, %v3571_v26 }
 0x3d5   :  { %v3573_v14 = vmax.f32 %v3572_v16, 0.0 }
 0x3d7   :  { %v3574_v15 = vadd.f32 1e-05, %v3573_v14 }
 0x3d9   :  { %6698 = vrsqrt.f32 %v3574_v15 }
 0x3e3   :  { %v6699_v17 = vpop.eup %6698 }
 0x3e4   :  { %5453 = vmatmul.mubr.msk.f32.vlgmr.msra.gmra.mrb[34].mxu0 %vm3576_vm12, %v6699_v17 }
 0x3e5   :  { %5848 = vmatpush3.msk.msra.mxu0 %vm2937_vm6, %v3229_v9  ;;  %5849 = vmatprep.mubr.msk.f32.mxu0 %vm6711_vm1, %v6710_v10 }
 0x3e6   :  { %5707 = vmatprep.subr.bf16.mxu0 %v6670_v20  ;;  %v4190_v20 = vld [vmem:[%s8425_s8 + $0x8] sm:$0xff] }
 0x3e8   :  { %5850 = vmatmul.mubr.msk.f32.vlgmr.msra.gmra.mrb[36].mxu0 %vm3576_vm12, %v6699_v17 }
 0x3e9   :  { %5708 = vmatpush3.bf16.msra.mxu0 %v6671_v21 }
 0x3ea   :  { %5709 = vmatprep.subr.bf16.mxu0 %v6672_v23 }
 0x3ed   :  { %5710 = vmatpush3.bf16.msra.mxu0 %v6673_v24 }
 0x3ee   :  { %5711 = vmatprep.subr.bf16.mxu0 %v6674_v25 }
 0x3f1   :  { %5712 = vmatpush3.bf16.msra.mxu0 %v6675_v27 }
 0x3f2   :  { %5713 = vmatprep.subr.bf16.mxu0 %v6676_v28 }
 0x3f5   :  { %5714 = vmatpush3.bf16.msra.mxu0 %v6677_v29  ;;  %v4191_v29 = vld [vmem:[%s8425_s8 + $0x10] sm:$0xff] }
 0x3f6   :  { %5715 = vmatprep.subr.bf16.mxu0 %v6678_v30  ;;  %v4192_v30 = vld [vmem:[%s8425_s8 + $0x18] sm:$0xff] }
 0x3f9   :  { %5716 = vmatpush3.bf16.msra.mxu0 %v6679_v31  ;;  %v6080_v31 = vpack.c.bf16 %v4192_v30, %v4191_v29  ;;  %v6692_v29 = vld [vmem:[%s8427_s12 + $0x18] sm:$0xff]   ;;  %v6693_v30 = vld [vmem:[%s8427_s12 + $0x20] sm:$0xff]  }
 0x3fa   :  { %5717 = vmatprep.subr.bf16.mxu0 %v6680_v32  ;;  %v4193_v32 = vld [vmem:[%s8425_s8 + $0x20] sm:$0xff] }
 0x3fd   :  { %5718 = vmatpush3.bf16.msra.mxu0 %v6681_v33  ;;  %v4194_v33 = vld [vmem:[%s8425_s8 + $0x28] sm:$0xff] }
 0x3fe   :  { %5719 = vmatprep.subr.bf16.mxu0 %v6683_v35  ;;  %v6083_v34 = vpack.c.bf16 %v4194_v33, %v4193_v32  ;;  %v4195_v35 = vld [vmem:[%s8425_s8 + $0x30] sm:$0xff] }
 0x3ff   :  { %v6695_v32 = vld [vmem:[%s8427_s12 + $0x30] sm:$0x3f]  }
 0x400   :  { %v4618_v33 = vsel %vm2937_vm6, %v6695_v32, 0 }
 0x401   :  { %5720 = vmatpush3.bf16.msra.mxu0 %v6684_v36  ;;  %v4196_v36 = vld [vmem:[%s8425_s8 + $0x38] sm:$0xff] }
 0x402   :  { %5721 = vmatprep.subr.bf16.mxu0 %v6686_v39  ;;  %v6086_v38 = vpack.c.bf16 %v4196_v36, %v4195_v35  ;;  %v4197_v39 = vld [vmem:[%s8425_s8 + $0x40] sm:$0xff] }
 0x405   :  { %5722 = vmatpush3.bf16.msra.mxu0 %v6687_v40  ;;  %v4198_v40 = vld [vmem:[%s8425_s8 + $0x48] sm:$0xff] }
 0x406   :  { %6098 = vmatprep.subr.bf16.mxu0 %v6712_v48  ;;  %v6089_v41 = vpack.c.bf16 %v4198_v40, %v4197_v39 }
 0x49c   :  { %v3655_v45 = vpop.f32.mrb[30].mxu0 }
 0x49d   :  { %v3877_v46 = vrot.slane %v3655_v45, %v8197_v44  ;;  %v3657_v47 = vpop.f32.mrb[31].mxu0  ;;  %v4200_v45 = vld [vmem:[%s8425_s8 + $0x58] sm:$0xff] }
 0x49e   :  { %v3881_v19 = vrot.slane %v3657_v47, %v8197_v44  ;;  %v4201_v47 = vld [vmem:[%s8425_s8 + $0x60] sm:$0xff] }
 0x49f   :  { %v3886_v49 = vsub.f32 %v8059_v63, %v3877_v46  ;;  %v3908_v63 = vrot.slane %v3230_v22, %v8197_v44  ;;  %v6092_v46 = vpack.c.bf16 %v4200_v45, %v4199_v42  ;;  %v5484_v42 = vld [vmem:[%s8428_s10] ss:$0 sm:$0xff] }
 0x4a0   :  { %v3887_v50 = vsub.f32 %v8067_v3, %v3881_v19  ;;  %v3726_v51 = vpop.f32.mrb[32].mxu0  ;;  %v4202_v19 = vld [vmem:[%s8425_s8 + $0x68] sm:$0xf] }
 0x4a1   :  { %v5846_v60 = vpop.f32.mrb[33].mxu0  ;;  %v3885_v55 = vrot.slane %v3726_v51, %v8197_v44 }
 0x4a3   :  { %v3888_v4 = vsub.f32 %v8057_v58, %v3885_v55  ;;  %v4189_v58 = vld [vmem:[%s8425_s8] sm:$0xff] }
 0x4a4   :  { %v6077_v27 = vpack.c.bf16 %v4190_v20, %v4189_v58 }
 0x4b7   :  { %v3799_v54 = vpop.f32.mrb[34].mxu0 }
 0x4b8   :  { %v3892_v37 = vrot.slane %v3799_v54, %v8197_v44  ;;  %v3801_v3 = vpop.f32.mrb[35].mxu0 }
 0x4b9   :  { %v3896_v57 = vrot.slane %v3801_v3, %v8197_v44 }
 0x4ba   :  { %v3901_v61 = vmul.f32 %v3892_v37, %v3886_v49  ;;  %v6095_v49 = vpack.c.bf16 %v4202_v19, %v4201_v47 }
 0x4bb   :  { %v3902_v0 = vmul.f32 %v3896_v57, %v3887_v50  ;;  %v3870_v2 = vpop.f32.mrb[36].mxu0 }
 0x4bc   :  { %v3920_v5 = vmul.f32 %v3908_v63, %v3901_v61  ;;  %v3900_v6 = vrot.slane %v3870_v2, %v8197_v44  ;;  %v5851_v8 = vpop.f32.mrb[37].mxu0 }
 0x4bd   :  { %v3921_v9 = vmul.f32 %v3912_v59, %v3902_v0 }
 0x4be   :  { %v3939_v11 = vadd.f32 %v3927_v62, %v3920_v5  ;;  %v3903_v12 = vmul.f32 %v3900_v6, %v3888_v4 }
 0x4bf   :  { %v3940_v13 = vadd.f32 %v3931_v1, %v3921_v9 }
 0x4c0   :  { %v3945_v18 = vmul.f32 0.2, %v3939_v11  ;;  %v3922_v26 = vmul.f32 %v3916_v7, %v3903_v12  ;;  %vm3942_vm14 = vcmp.gt.f32.partialorder %v3939_v11, 0.0  ;;  %v4203_v12 = vld [vmem:[%s8426_s9] sm:$0xff] }
 0x4c1   :  { %vm3943_vm15 = vcmp.gt.f32.partialorder %v3940_v13, 0.0  ;;  %v3946_v16 = vmul.f32 0.2, %v3940_v13 }
 0x4c2   :  { %v3941_v14 = vadd.f32 %v3935_v43, %v3922_v26  ;;  %v3948_v15 = vsel %vm3942_vm14, %v3939_v11, %v3945_v18  ;;  %v4204_v43 = vld [vmem:[%s8426_s9 + $0x8] sm:$0xf] }
 0x4c3   :  { %v3949_v17 = vsel %vm3943_vm15, %v3940_v13, %v3946_v16  ;;  %v3951_v24 = vpack.c.bf16 %v3948_v15, %v3948_v15  ;;  %v6121_v13 = vpack.c.bf16 %v4204_v43, %v4203_v12 }
 0x4c4   :  { %vm3944_vm0 = vcmp.gt.f32.partialorder %v3941_v14, 0.0  ;;  %v3947_v21 = vmul.f32 0.2, %v3941_v14  ;;  %v3952_v23 = vpack.c.bf16 %v3949_v17, %v3949_v17 }
 0x4c6   :  { %v3950_v25 = vsel %vm3944_vm0, %v3941_v14, %v3947_v21  ;;  %4141 = vmatprep.mubr.bf16.mxu0 %v3952_v23 }
 0x4c7   :  { %v3953_v28 = vpack.c.bf16 %v3950_v25, %v3950_v25  ;;  %4142 = vmatmul.mubr.bf16.vlgmr.msra.gmra.mrb[40].mxu0 %v3951_v24  ;;  %v6689_v25 = vld [vmem:[%s8427_s12] sm:$0xff]  }
 0x4c8   :  { %6100 = vmatpush3.bf16.msra.mxu0 %v6077_v27  ;;  %5921 = vmatprep.mubr.msk.f32.mxu0 %vm6711_vm1, %v6710_v10 }
 0x4c9   :  { %5859 = vmatmul.mubr.msk.bf16.vlgmr.msra.gmra.mrb[20].mxu1 %vm3279_vm11, %v3953_v28  ;;  %6101 = vmatprep.subr.bf16.mxu0 %v6712_v48  ;;  %v6691_v28 = vld [vmem:[%s8427_s12 + $0x10] sm:$0xff]  }
 0x4ca   :  { %6078 = vmatpush3.bf16.msra.mxu1 %v6077_v27  ;;  %5890 = vmatprep.mubr.msk.f32.mxu1 %vm6711_vm1, %v6710_v10  ;;  %v6690_v27 = vld [vmem:[%s8427_s12 + $0x8] sm:$0xff]  }
 0x4cb   :  { %6079 = vmatprep.subr.bf16.mxu1 %v6712_v48 }
 0x4cc   :  { %6103 = vmatpush3.bf16.msra.mxu0 %v6080_v31 }
 0x4cd   :  { %6104 = vmatprep.subr.bf16.mxu0 %v6712_v48 }
 0x4ce   :  { %6081 = vmatpush3.bf16.msra.mxu1 %v6080_v31  ;;  %v6694_v31 = vld [vmem:[%s8427_s12 + $0x28] sm:$0xff]  }
 0x4cf   :  { %6082 = vmatprep.subr.bf16.mxu1 %v6712_v48 }
 0x4d0   :  { %6106 = vmatpush3.bf16.msra.mxu0 %v6083_v34 }
 0x4d1   :  { %6107 = vmatprep.subr.bf16.mxu0 %v6712_v48 }
 0x4d2   :  { %6084 = vmatpush3.bf16.msra.mxu1 %v6083_v34 }
 0x4d3   :  { %6085 = vmatprep.subr.bf16.mxu1 %v6712_v48 }
 0x4d4   :  { %6109 = vmatpush3.bf16.msra.mxu0 %v6086_v38 }
 0x4d5   :  { %6110 = vmatprep.subr.bf16.mxu0 %v6712_v48 }
 0x4d6   :  { %6087 = vmatpush3.bf16.msra.mxu1 %v6086_v38 }
 0x4d7   :  { %6088 = vmatprep.subr.bf16.mxu1 %v6712_v48 }
 0x4d8   :  { %6112 = vmatpush3.bf16.msra.mxu0 %v6089_v41 }
 0x4d9   :  { %6113 = vmatprep.subr.bf16.mxu0 %v6712_v48 }
 0x4da   :  { %6090 = vmatpush3.bf16.msra.mxu1 %v6089_v41 }
 0x4db   :  { %6091 = vmatprep.subr.bf16.mxu1 %v6712_v48 }
 0x4dc   :  { %6115 = vmatpush3.bf16.msra.mxu0 %v6092_v46 }
 0x4dd   :  { %6116 = vmatprep.subr.bf16.mxu0 %v6712_v48 }
 0x4de   :  { %6093 = vmatpush3.bf16.msra.mxu1 %v6092_v46  ;;  %v5485_v46 = vld [vmem:[%s8429_s11] ss:$0 sm:$0xff] }
 0x4df   :  { %6094 = vmatprep.subr.bf16.mxu1 %v6712_v48 }
 0x4e0   :  { %6119 = vmatpush3.bf16.msk.msra.mxu0 %vm8278_vm4, %v6095_v49 }
 0x4e1   :  { %6120 = vmatprep.subr.bf16.mxu0 %v6712_v48 }
 0x4e2   :  { %6097 = vmatpush3.bf16.msk.msra.mxu1 %vm8278_vm4, %v6095_v49 }
 0x4e3   :  { %6124 = vmatprep.subr.bf16.mxu1 %v6712_v48 }
 0x59a   :  { %v5723_v51 = vpop.f32.mrb[40].mxu0 }
 0x59b   :  { %v5724_v60 = vpop.f32.mrb[41].mxu0 }
 0x59c   :  { %v5725_v22 = vadd.f32 %v5724_v60, %v5723_v51  ;;  %v5726_v52 = vpop.f32.mrb[42].mxu0  ;;  %v4183_v53 = vpop.f32.mrb[20].mxu1  ;;  %v4660_v60 = vld [vmem:[%s8430_s13] sm:$0xff] }
 0x59d   :  { %v5727_v54 = vpop.f32.mrb[43].mxu0  ;;  %v5860_v55 = vpop.f32.mrb[21].mxu1 }
 0x59e   :  { %v8288_v37 = vadd.f32 %v5725_v22, %v4183_v53  ;;  %v4186_v63 = vpop.f32.mrb[22].mxu1  ;;  %v4661_v22 = vld [vmem:[%s8430_s13 + $0x8] sm:$0xff]  ;;  %v4662_v53 = vld [vmem:[%s8430_s13 + $0x10] sm:$0xff] }
 0x59f   :  { %v5861_v3 = vpop.f32.mrb[23].mxu1  ;;  %v6129_v52 = vpack.c.bf16 %v4661_v22, %v4660_v60 }
 0x5a0   :  { %v4208_v56 = vsel %vm4207_vm5, %v8288_v37, 0.0  ;;  %v4215_v57 = vmul.f32 %v8288_v37, %v8288_v37 }
 0x5a1   :  { %v4209_v59 = vrot.slane %v4208_v56, 4 }
 0x5a2   :  { %v4216_v61 = vsel %vm4207_vm5, %v4215_v57, 0.0 }
 0x5a3   :  { %v4210_v62 = vadd.f32 %v4209_v59, %v4208_v56  ;;  %v4217_v0 = vrot.slane %v4216_v61, 4 }
 0x5a5   :  { %v4211_v1 = vrot.slane %v4210_v62, 2  ;;  %v4218_v2 = vadd.f32 %v4217_v0, %v4216_v61 }
 0x5a7   :  { %v4212_v4 = vadd.f32 %v4211_v1, %v4210_v62  ;;  %v4219_v5 = vrot.slane %v4218_v2, 2 }
 0x5a9   :  { %v4213_v6 = vrot.slane %v4212_v4, 1  ;;  %v4220_v7 = vadd.f32 %v4219_v5, %v4218_v2 }
 0x5ab   :  { %v4214_v8 = vadd.f32 %v4213_v6, %v4212_v4  ;;  %v4221_v9 = vrot.slane %v4220_v7, 1 }
 0x5ad   :  { %5891 = vmatmul.mubr.msk.f32.vlgmr.msra.gmra.mrb[18].mxu1 %vm4223_vm7, %v4214_v8  ;;  %v4222_v11 = vadd.f32 %v4221_v9, %v4220_v7  ;;  %v4663_v9 = vld [vmem:[%s8431_s14] sm:$0xff] }
 0x5ae   :  { %5935 = vmatprep.mubr.msk.f32.mxu1 %vm6711_vm1, %v6710_v10  ;;  %6127 = vmatpush3.bf16.msk.msra.mxu1 %vm8278_vm4, %v6121_v13 }
 0x5af   :  { %5922 = vmatmul.mubr.msk.f32.vlgmr.msra.gmra.mrb[38].mxu0 %vm4223_vm7, %v4222_v11  ;;  %5938 = vmatprep.subr.bf16.mxu1 %v6710_v10  ;;  %v4664_v11 = vld [vmem:[%s8431_s14 + $0x8] sm:$0xff] }
 0x5b0   :  { %5928 = vmatprep.mubr.msk.f32.mxu0 %vm6711_vm1, %v6710_v10  ;;  %6123 = vmatpush3.bf16.msk.msra.mxu0 %vm8278_vm4, %v6121_v13  ;;  %v6135_v12 = vpack.c.bf16 %v4664_v11, %v4663_v9  ;;  %v4665_v13 = vld [vmem:[%s8431_s14 + $0x10] sm:$0xff] }
 0x5b1   :  { %6128 = vmatprep.subr.bf16.mxu0 %v6712_v48 }
 0x680   :  { %v4297_v18 = vpop.f32.mrb[18].mxu1 }
 0x681   :  { %v4301_v26 = vmul.f32 0.055555556, %v4297_v18  ;;  %v5892_v16 = vpop.f32.mrb[19].mxu1 }
 0x682   :  { %v4371_v14 = vpop.f32.mrb[38].mxu0 }
 0x683   :  { %v4376_v15 = vmul.f32 %v4301_v26, %v4301_v26  ;;  %v4375_v17 = vmul.f32 0.055555556, %v4371_v14  ;;  %v5923_v58 = vpop.f32.mrb[39].mxu0  ;;  %5929 = vmatmul.mubr.msk.f32.vlgmr.msra.gmra.mrb[44].mxu0 %vm4381_vm8, %v4301_v26 }
 0x684   :  { %5962 = vmatprep.mubr.msk.f32.mxu0 %vm6711_vm1, %v6710_v10  ;;  %6130 = vmatpush3.bf16.msra.mxu0 %v6129_v52 }
 0x685   :  { %v4377_v20 = vsub.f32 %v4375_v17, %v4376_v15  ;;  %5960 = vmatprep.subr.mxu0 %v6710_v10 }
 0x687   :  { %v4378_v21 = vmax.f32 %v4377_v20, 0.0 }
 0x688   :  { %5961 = vmatpush3.msra.mxu0 %v4662_v53 }
 0x689   :  { %v4379_v23 = vadd.f32 1e-05, %v4378_v21  ;;  %6131 = vmatprep.subr.bf16.mxu0 %v6712_v48 }
 0x68b   :  { %6700 = vrsqrt.f32 %v4379_v23 }
 0x695   :  { %v6701_v24 = vpop.eup %6700 }
 0x696   :  { %5936 = vmatmul.mubr.msk.f32.vlgmr.msra.gmra.mrb[24].mxu1 %vm4381_vm8, %v6701_v24  ;;  %v6696_v24 = vld [vmem:[%s8432_s17] sm:$0xff]  }
 0x697   :  { %5952 = vmatprep.mubr.msk.bf16.mxu1 %vm6711_vm1, %v6710_v10  ;;  %5939 = vmatpush3.bf16.msra.mxu1 %v6689_v25  ;;  %v6697_v25 = vld [vmem:[%s8432_s17 + $0x8] ss:$0 sps:$4 sm:$0xff]  }
 0x698   :  { %5940 = vmatprep.subr.bf16.mxu1 %v6710_v10 }
 0x69b   :  { %5941 = vmatpush3.bf16.msra.mxu1 %v6690_v27  ;;  %v5028_v27 = vsel %vm4227_vm2, %v6697_v25, 0 }
 0x69c   :  { %5942 = vmatprep.subr.bf16.mxu1 %v6710_v10 }
 0x69f   :  { %5943 = vmatpush3.bf16.msra.mxu1 %v6691_v28 }
 0x6a0   :  { %5944 = vmatprep.subr.bf16.mxu1 %v6710_v10 }
 0x6a3   :  { %5945 = vmatpush3.bf16.msra.mxu1 %v6692_v29 }
 0x6a4   :  { %5946 = vmatprep.subr.bf16.mxu1 %v6710_v10 }
 0x6a7   :  { %5947 = vmatpush3.bf16.msra.mxu1 %v6693_v30 }
 0x6a8   :  { %5948 = vmatprep.subr.bf16.mxu1 %v6710_v10 }
 0x6ab   :  { %5949 = vmatpush3.bf16.msra.mxu1 %v6694_v31 }
 0x6ac   :  { %5950 = vmatprep.subr.bf16.mxu1 %v6710_v10 }
 0x6af   :  { %5951 = vmatpush3.bf16.msra.mxu1 %v4618_v33 }
 0x6b0   :  { %5992 = vmatprep.subr.bf16.mxu1 %v6710_v10 }
 0x756   :  { %v4454_v34 = vpop.f32.mrb[44].mxu0 }
 0x757   :  { %v5930_v35 = vpop.f32.mrb[45].mxu0  ;;  %v4534_v36 = vrot.slane %v4454_v34, %v8197_v44 }
 0x759   :  { %v4535_v39 = vsub.f32 %v8288_v37, %v4534_v36  ;;  %v5499_v36 = vld [vmem:[%s8434_s16] ss:$0 sm:$0xff] }
 0x769   :  { %v4527_v38 = vpop.f32.mrb[24].mxu1 }
 0x76a   :  { %v4539_v40 = vrot.slane %v4527_v38, %v8197_v44  ;;  %v5937_v41 = vpop.f32.mrb[25].mxu1 }
 0x76c   :  { %v4540_v45 = vmul.f32 %v4539_v40, %v4535_v39 }
 0x76e   :  { %v4547_v47 = vmul.f32 %v5484_v42, %v4540_v45 }
 0x770   :  { %v4554_v19 = vadd.f32 %v5485_v46, %v4547_v47 }
 0x772   :  { %vm4555_vm6 = vcmp.gt.f32.partialorder %v4554_v19, 0.0  ;;  %v4556_v49 = vmul.f32 0.2, %v4554_v19 }
 0x774   :  { %v4557_v50 = vsel %vm4555_vm6, %v4554_v19, %v4556_v49 }
 0x775   :  { %v4558_v51 = vpack.c.bf16 %v4557_v50, %v4557_v50 }
 0x777   :  { %5953 = vmatmul.mubr.msk.bf16.vlgmr.msra.gmra.mrb[28].mxu1 %vm4223_vm7, %v4558_v51 }
 0x778   :  { %5996 = vmatprep.mubr.msk.bf16.mxu1 %vm6711_vm1, %v6710_v10  ;;  %5993 = vmatpush3.bf16.msra.mxu1 %v6696_v24 }
 0x779   :  { %5994 = vmatprep.subr.bf16.mxu1 %v6710_v10 }
 0x77c   :  { %5995 = vmatpush3.bf16.msra.mxu1 %v5028_v27 }
 0x84a   :  { %v8367_v54 = vpop.f32.mrb[28].mxu1 }
 0x84b   :  { %v4669_v55 = vsel %vm4668_vm9, %v8367_v54, 0.0  ;;  %v4676_v37 = vmul.f32 %v8367_v54, %v8367_v54  ;;  %v5954_v63 = vpop.f32.mrb[29].mxu1 }
 0x84c   :  { %v4670_v3 = vrot.slane %v4669_v55, 4  ;;  %v4657_v56 = vpop.f32.mrb[30].mxu1 }
 0x84d   :  { %v4677_v57 = vsel %vm4668_vm9, %v4676_v37, 0.0  ;;  %v5955_v59 = vpop.f32.mrb[31].mxu1 }
 0x84e   :  { %v4671_v61 = vadd.f32 %v4670_v3, %v4669_v55  ;;  %v4678_v62 = vrot.slane %v4677_v57, 4 }
 0x850   :  { %v4672_v0 = vrot.slane %v4671_v61, 2  ;;  %v4679_v1 = vadd.f32 %v4678_v62, %v4677_v57 }
 0x852   :  { %v4673_v2 = vadd.f32 %v4672_v0, %v4671_v61  ;;  %v4680_v4 = vrot.slane %v4679_v1, 2 }
 0x854   :  { %v4674_v5 = vrot.slane %v4673_v2, 1  ;;  %v4681_v6 = vadd.f32 %v4680_v4, %v4679_v1 }
 0x856   :  { %v4675_v7 = vadd.f32 %v4674_v5, %v4673_v2  ;;  %v4682_v8 = vrot.slane %v4681_v6, 1 }
 0x858   :  { %5963 = vmatmul.mubr.msk.f32.vlgmr.msra.gmra.mrb[46].mxu0 %vm4684_vm10, %v4675_v7  ;;  %v4683_v43 = vadd.f32 %v4682_v8, %v4681_v6 }
 0x859   :  { %6133 = vmatpush3.bf16.msra.mxu0 %v6129_v52  ;;  %5971 = vmatprep.mubr.msk.f32.mxu0 %vm6711_vm1, %v6710_v10 }
 0x85a   :  { %5969 = vmatprep.subr.mxu0 %v6710_v10 }
 0x85d   :  { %5970 = vmatpush3.msra.mxu0 %v4662_v53 }
 0x85e   :  { %5972 = vmatmul.mubr.msk.f32.vlgmr.msra.gmra.mrb[48].mxu0 %vm4684_vm10, %v4683_v43  ;;  %6134 = vmatprep.subr.bf16.mxu0 %v6712_v48 }
 0x85f   :  { %6136 = vmatpush3.bf16.msra.mxu0 %v6135_v12  ;;  %5980 = vmatprep.mubr.msk.f32.mxu0 %vm6711_vm1, %v6710_v10 }
 0x860   :  { %5978 = vmatprep.subr.mxu0 %v6710_v10 }
 0x863   :  { %5979 = vmatpush3.msra.mxu0 %v4665_v13 }
 0x864   :  { %6137 = vmatprep.subr.bf16.mxu0 %v6712_v48 }
 0x92b   :  { %v4754_v18 = vpop.f32.mrb[46].mxu0 }
 0x92c   :  { %v4758_v26 = vmul.f32 0.5, %v4754_v18  ;;  %v5964_v16 = vpop.f32.mrb[47].mxu0 }
 0x92e   :  { %5981 = vmatmul.mubr.msk.f32.vlgmr.msra.gmra.mrb[50].mxu0 %vm4684_vm10, %v4758_v26  ;;  %v4833_v15 = vmul.f32 %v4758_v26, %v4758_v26 }
 0x92f   :  { %6139 = vmatpush3.bf16.msra.mxu0 %v6135_v12  ;;  %5989 = vmatprep.mubr.msk.f32.mxu0 %vm6711_vm1, %v6710_v10 }
 0x930   :  { %5987 = vmatprep.subr.mxu0 %v6710_v10  ;;  %v5498_v10 = vld [vmem:[%s8433_s15] ss:$0 sm:$0xff] }
 0x931   :  { %v4828_v14 = vpop.f32.mrb[48].mxu0 }
 0x932   :  { %v4832_v17 = vmul.f32 0.5, %v4828_v14  ;;  %v5973_v58 = vpop.f32.mrb[49].mxu0 }
 0x933   :  { %5988 = vmatpush3.msra.mxu0 %v4665_v13 }
 0x934   :  { %v4834_v20 = vsub.f32 %v4832_v17, %v4833_v15 }
 0x936   :  { %v4835_v21 = vmax.f32 %v4834_v20, 0.0 }
 0x938   :  { %v4836_v23 = vadd.f32 1e-05, %v4835_v21 }
 0x93a   :  { %6702 = vrsqrt.f32 %v4836_v23 }
 0x944   :  { %v6703_v48 = vpop.eup %6702 }
 0x945   :  { %5990 = vmatmul.mubr.msk.f32.vlgmr.msra.gmra.mrb[52].mxu0 %vm4684_vm10, %v6703_v48 }
 0xa01   :  { %v4907_v28 = vpop.f32.mrb[50].mxu0 }
 0xa02   :  { %v4987_v29 = vrot.slane %v4907_v28, %v8197_v44  ;;  %v5982_v30 = vpop.f32.mrb[51].mxu0 }
 0xa04   :  { %v4988_v31 = vsub.f32 %v8367_v54, %v4987_v29 }
 0xa18   :  { %v4980_v32 = vpop.f32.mrb[52].mxu0 }
 0xa19   :  { %v4992_v33 = vrot.slane %v4980_v32, %v8197_v44  ;;  %v5991_v34 = vpop.f32.mrb[53].mxu0 }
 0xa1b   :  { %v4993_v35 = vmul.f32 %v4992_v33, %v4988_v31 }
 0xa1d   :  { %v5000_v38 = vmul.f32 %v5498_v10, %v4993_v35 }
 0xa1f   :  { %v5007_v39 = vadd.f32 %v5499_v36, %v5000_v38 }
 0xa21   :  { %vm5008_vm1 = vcmp.gt.f32.partialorder %v5007_v39, 0.0  ;;  %v5009_v40 = vmul.f32 0.2, %v5007_v39 }
 0xa23   :  { %v5010_v41 = vsel %vm5008_vm1, %v5007_v39, %v5009_v40 }
 0xa24   :  { %v5011_v42 = vpack.c.bf16 %v5010_v41, %v5010_v41 }
 0xa26   :  { %5997 = vmatmul.mubr.msk.bf16.vlgmr.msra.gmra.mrb[32].mxu1 %vm4684_vm10, %v5011_v42 }
 0xaf9   :  { %v5064_v45 = vpop.f32.mrb[32].mxu1 }
 0xafa   :  { %v5070_v44 = vsub.f32 0.0, %v5064_v45  ;;  %v5998_v46 = vpop.f32.mrb[33].mxu1 }
 0xafb   :  { %v5067_v47 = vpop.f32.mrb[34].mxu1 }
 0xafc   :  { %v5071_v19 = vmul.f32 1.442695, %v5070_v44  ;;  %v5999_v49 = vpop.f32.mrb[35].mxu1 }
 0xafe   :  { %6704 = vpow2.f32 %v5071_v19 }
 0xb08   :  { %v6705_v50 = vpop.eup %6704 }
 0xb09   :  { %v5073_v51 = vadd.f32 1.0, %v6705_v50 }
 0xb0b   :  { %6706 = vrcp.f32 %v5073_v51 }
 0xb15   :  { %v6707_v60 = vpop.eup %6706 }
 0xb16   :  { %5075 = vst [vmem:[%s8435_s18] sm:$0x3] %v6707_v60 }

</bundles_post_ra>
